<compile_context>
chip_gen: v7x
topology: tpu7x:2x2x1
jax: 0.10.0
libtpu: 0.0.40
codegen_flags: <defaults>
</compile_context>

<pallas_src>
import functools

import jax
import jax.numpy as jnp
from jax.experimental import pallas as pl
from jax.experimental.pallas import tpu as pltpu

F32 = jnp.float32
LANES = 128  # batch samples per lane-block


# ----------------------------- kernel helpers ------------------------------
def _shift_prev(h, tb):
    """h[:, (l-1) block], zeros at l == 0.  128-aligned lane-block shift."""
    z = jnp.zeros((h.shape[0], tb), F32)
    return jnp.concatenate([z, h[:, :-tb]], axis=1)


def _shift_next(h, tb):
    """h[:, (l+1) block], zeros at l == L-1."""
    z = jnp.zeros((h.shape[0], tb), F32)
    return jnp.concatenate([h[:, tb:], z], axis=1)


def _maxpool2(h, tb):
    """(C, L*tb) -> (C, (L//2)*tb): max over adjacent 128-lane blocks."""
    n_out = h.shape[1] // (2 * tb)
    return jnp.concatenate(
        [jnp.maximum(h[:, (2 * m) * tb:(2 * m + 1) * tb],
                     h[:, (2 * m + 1) * tb:(2 * m + 2) * tb])
         for m in range(n_out)], axis=1)


def _mm(w, h):
    return jnp.dot(w, h, preferred_element_type=F32)


# --------------------------------- kernel ----------------------------------
def _autoencoder_kernel(x_ref, w1_ref, b1_ref, w2_ref, b2_ref,
                        u1_ref, c1_ref, u2_ref, c2_ref, o_ref, *, tb, length):
    x = x_ref[0]                                       # (2, L*TB)

    # Conv1d(2 -> 16, k=3, pad=1) + ReLU: three K=2 channel-mix matmuls.
    h = (_mm(w1_ref[0], _shift_prev(x, tb))
         + _mm(w1_ref[1], x)
         + _mm(w1_ref[2], _shift_next(x, tb)))
    h = jax.nn.relu(h + b1_ref[...])                   # (16, L*TB)

    # MaxPool1d(2)
    h = _maxpool2(h, tb)                               # (16, (L/2)*TB)

    # Conv1d(16 -> 8, k=3, pad=1) + ReLU, im2col over the 3 taps (K = 48).
    s = jnp.concatenate([_shift_prev(h, tb), h, _shift_next(h, tb)], axis=0)
    h = jax.nn.relu(_mm(w2_ref[...], s) + b2_ref[...])  # (8, (L/2)*TB)

    # MaxPool1d(2)
    h = _maxpool2(h, tb)                               # (8, (L/4)*TB)

    # ConvTranspose1d(8 -> 16, k=2, s=2) + ReLU: both taps in one matmul.
    d = jax.nn.relu(_mm(u1_ref[...], h) + c1_ref[...])  # (32, (L/4)*TB)
    d_even, d_odd = d[:16], d[16:]                     # deconv1 outputs 2m / 2m+1

    # ConvTranspose1d(16 -> 2, k=2, s=2) + Sigmoid, stored straight into o_ref.
    y00 = jax.nn.sigmoid(_mm(u2_ref[0], d_even) + c2_ref[...])  # out pos 4m + 0
    y01 = jax.nn.sigmoid(_mm(u2_ref[1], d_even) + c2_ref[...])  # out pos 4m + 1
    y10 = jax.nn.sigmoid(_mm(u2_ref[0], d_odd) + c2_ref[...])   # out pos 4m + 2
    y11 = jax.nn.sigmoid(_mm(u2_ref[1], d_odd) + c2_ref[...])   # out pos 4m + 3

    for m in range(length // 4):
        src = m * tb
        for j, y in enumerate((y00, y01, y10, y11)):
            dst = (4 * m + j) * tb
            o_ref[0, :, dst:dst + tb] = y[:, src:src + tb].astype(o_ref.dtype)


# -------------------------------- wrapper -----------------------------------
def _pick_batch_tile(n, length, max_tile=512):
    """Lanes per grid step: multiple of 128, >=2 grid steps when possible
    (v7x has 2 TensorCores), bounded by a crude per-step VMEM budget."""
    blocks = max(1, pl.cdiv(n, LANES))
    tile_blocks = 1 if blocks <= 1 else min(max_tile // LANES, max(1, blocks // 2))
    # ~100 live f32 rows of width length*tile per step; keep well under v7x's
    # 64 MiB physical VMEM.  TODO(synk): tile L with a halo for very long
    # sequences instead of only shrinking the batch tile.
    while tile_blocks > 1 and 400 * length * LANES * tile_blocks > (40 << 20):
        tile_blocks -= 1
    return tile_blocks * LANES


def cnn_autoencoder_pallas(x_ncl, params, *, max_batch_tile=512):
    """x_ncl: (N, 2, L) float32, PyTorch NCL layout.  Returns (N, 2, L)."""
    w1, b1, w2, b2, tw1, tb1, tw2, tb2 = params
    N, cin, L = x_ncl.shape
    assert cin == 2 and L % 4 == 0 and L >= 4

    tb = _pick_batch_tile(N, L, max_batch_tile)
    n_pad = pl.cdiv(N, tb) * tb
    nb = n_pad // tb

    x = x_ncl.astype(F32)
    if n_pad != N:
        x = jnp.pad(x, ((0, n_pad - N), (0, 0), (0, 0)))
    # (N_pad, 2, L) -> (NB, 2, L*TB): channel-major rows, l-major columns.
    x_arr = x.reshape(nb, tb, 2, L).transpose(0, 2, 3, 1).reshape(nb, 2, L * tb)

    # Conv1d weight (O, I, K): per-tap (K, O, I);   fused conv2: (O, K*I)
    # ConvT1d weight (I, O, K): tap-stacked (K*O, I) / per-tap (K, O, I)
    w1_k = jnp.transpose(w1.astype(F32), (2, 0, 1))                   # (3, 16, 2)
    b1_k = b1.astype(F32).reshape(16, 1)
    w2_k = jnp.transpose(w2.astype(F32), (0, 2, 1)).reshape(8, 48)    # (8, 48)
    b2_k = b2.astype(F32).reshape(8, 1)
    u1_k = jnp.transpose(tw1.astype(F32), (2, 1, 0)).reshape(32, 8)   # (32, 8)
    c1_k = jnp.concatenate([tb1, tb1]).astype(F32).reshape(32, 1)
    u2_k = jnp.transpose(tw2.astype(F32), (2, 1, 0))                  # (2, 2, 16)
    c2_k = tb2.astype(F32).reshape(2, 1)

    def const(a):  # small weight, resident across the grid
        return pl.BlockSpec(a.shape, lambda n, nd=a.ndim: (0,) * nd)

    kernel = functools.partial(_autoencoder_kernel, tb=tb, length=L)
    out_arr = pl.pallas_call(
        kernel,
        out_shape=jax.ShapeDtypeStruct((nb, 2, L * tb), F32),
        grid=(nb,),
        in_specs=[
            pl.BlockSpec((1, 2, L * tb), lambda n: (n, 0, 0)),
            const(w1_k), const(b1_k), const(w2_k), const(b2_k),
            const(u1_k), const(c1_k), const(u2_k), const(c2_k),
        ],
        out_specs=pl.BlockSpec((1, 2, L * tb), lambda n: (n, 0, 0)),
        compiler_params=pltpu.CompilerParams(
            dimension_semantics=("parallel",),
            vmem_limit_bytes=48 * 1024 * 1024),
    )(x_arr, w1_k, b1_k, w2_k, b2_k, u1_k, c1_k, u2_k, c2_k)

    out = (out_arr.reshape(nb, 2, L, tb).transpose(0, 3, 1, 2)
           .reshape(n_pad, 2, L)[:N])
    return out


# ---------------- pure-JAX reference (PyTorch semantics, NCL) ----------------
def ref_forward(x, params):
    w1, b1, w2, b2, tw1, tb1, tw2, tb2 = params

    def conv1d_p1(h, w, b):                 # w: (O, I, 3), pad=1
        N, C, L = h.shape
        hp = jnp.pad(h, ((0, 0), (0, 0), (1, 1)))
        y = sum(jnp.einsum('oi,nil->nol', w[:, :, k], hp[:, :, k:k + L])
                for k in range(3))
        return y + b[None, :, None]

    def maxpool2(h):
        N, C, L = h.shape
        return h.reshape(N, C, L // 2, 2).max(-1)

    def deconv_s2(h, w, b):                 # w: (I, O, 2), stride=2
        ys = [jnp.einsum('io,nil->nol', w[:, :, k], h) for k in range(2)]
        y = jnp.stack(ys, axis=-1).reshape(h.shape[0], w.shape[1],
                                           2 * h.shape[2])
        return y + b[None, :, None]

    h = jax.nn.relu(conv1d_p1(x, w1, b1)); h = maxpool2(h)
    h = jax.nn.relu(conv1d_p1(h, w2, b2)); h = maxpool2(h)
    d = jax.nn.relu(deconv_s2(h, tw1, tb1))
    return jax.nn.sigmoid(deconv_s2(d, tw2, tb2))


def init_params(key):
    ks = jax.random.split(key, 8)
    s = 0.2
    w1 = s * jax.random.normal(ks[0], (16, 2, 3), F32)    # Conv1d(2,16,3)
    b1 = s * jax.random.normal(ks[1], (16,), F32)
    w2 = s * jax.random.normal(ks[2], (8, 16, 3), F32)    # Conv1d(16,8,3)
    b2 = s * jax.random.normal(ks[3], (8,), F32)
    tw1 = s * jax.random.normal(ks[4], (8, 16, 2), F32)   # ConvT1d(8,16,2,2)
    tb1 = s * jax.random.normal(ks[5], (16,), F32)
    tw2 = s * jax.random.normal(ks[6], (16, 2, 2), F32)   # ConvT1d(16,2,2,2)
    tb2 = s * jax.random.normal(ks[7], (2,), F32)
    return (w1, b1, w2, b2, tw1, tb1, tw2, tb2)


if __name__ == "__main__":
    key = jax.random.PRNGKey(0)
    k_x, k_p = jax.random.split(key)
    params = init_params(k_p)

    N, C, L = 4, 2, 16
    x = jax.random.normal(k_x, (N, C, L), F32)             # NCL, like PyTorch

    fwd = jax.jit(cnn_autoencoder_pallas)
    out = jax.block_until_ready(fwd(x, params))

    ref = ref_forward(x, params)
    assert out.shape == (N, C, L)
    max_err = float(jnp.max(jnp.abs(out - ref)))
    # Default MXU precision (bf16 passes, f32 accumulation) on both paths.
    assert max_err < 2e-2, f"max abs err {max_err}"

    print("KERNEL_OK")
</pallas_src>

<mosaic_0001>
module attributes {stable_mosaic.version = 11 : i64} {
  func.func @_autoencoder_kernel(%arg0: i32, %arg1: memref<1x2x2048xf32, #tpu.memory_space<vmem>>, %arg2: memref<3x16x2xf32, #tpu.memory_space<vmem>>, %arg3: memref<16x1xf32, #tpu.memory_space<vmem>>, %arg4: memref<8x48xf32, #tpu.memory_space<vmem>>, %arg5: memref<8x1xf32, #tpu.memory_space<vmem>>, %arg6: memref<32x8xf32, #tpu.memory_space<vmem>>, %arg7: memref<32x1xf32, #tpu.memory_space<vmem>>, %arg8: memref<2x2x16xf32, #tpu.memory_space<vmem>>, %arg9: memref<2x1xf32, #tpu.memory_space<vmem>>, %arg10: memref<1x2x2048xf32, #tpu.memory_space<vmem>>) attributes {dimension_semantics = [#tpu.dimension_semantics<parallel>], iteration_bounds = array<i64: 1>, scalar_prefetch = 0 : i64, scratch_operands = 0 : i64, tpu.core_type = #tpu.core_type<tc>, window_params = [{transform_indices = @transform_0, window_bounds = array<i64: 1, 2, 2048>}, {pipeline_mode = #tpu.pipeline_mode<synchronous>, transform_indices = @transform_1, window_bounds = array<i64: 3, 16, 2>}, {pipeline_mode = #tpu.pipeline_mode<synchronous>, transform_indices = @transform_2, window_bounds = array<i64: 16, 1>}, {pipeline_mode = #tpu.pipeline_mode<synchronous>, transform_indices = @transform_3, window_bounds = array<i64: 8, 48>}, {pipeline_mode = #tpu.pipeline_mode<synchronous>, transform_indices = @transform_4, window_bounds = array<i64: 8, 1>}, {pipeline_mode = #tpu.pipeline_mode<synchronous>, transform_indices = @transform_5, window_bounds = array<i64: 32, 8>}, {pipeline_mode = #tpu.pipeline_mode<synchronous>, transform_indices = @transform_6, window_bounds = array<i64: 32, 1>}, {pipeline_mode = #tpu.pipeline_mode<synchronous>, transform_indices = @transform_7, window_bounds = array<i64: 2, 2, 16>}, {pipeline_mode = #tpu.pipeline_mode<synchronous>, transform_indices = @transform_8, window_bounds = array<i64: 2, 1>}, {transform_indices = @transform_9, window_bounds = array<i64: 1, 2, 2048>}]} {
    %c0 = arith.constant 0 : index
    %c0_0 = arith.constant 0 : index
    %c0_1 = arith.constant 0 : index
    %0 = vector.load %arg1[%c0, %c0_0, %c0_1] : memref<1x2x2048xf32, #tpu.memory_space<vmem>>, vector<1x2x2048xf32>
    %1 = vector.shape_cast %0 : vector<1x2x2048xf32> to vector<2x2048xf32>
    %c0_2 = arith.constant 0 : index
    %c0_3 = arith.constant 0 : index
    %c0_4 = arith.constant 0 : index
    %2 = vector.load %arg2[%c0_2, %c0_3, %c0_4] : memref<3x16x2xf32, #tpu.memory_space<vmem>>, vector<1x16x2xf32>
    %3 = vector.shape_cast %2 : vector<1x16x2xf32> to vector<16x2xf32>
    %cst = arith.constant 0.000000e+00 : f32
    %4 = vector.broadcast %cst : f32 to vector<2x128xf32>
    %5 = vector.extract_strided_slice %1 {offsets = [0, 0], sizes = [2, 1920], strides = [1, 1]} : vector<2x2048xf32> to vector<2x1920xf32>
    %6 = tpu.concatenate %4, %5 in 1 : vector<2x128xf32>, vector<2x1920xf32> -> vector<2x2048xf32>
    %cst_5 = arith.constant dense<0.000000e+00> : vector<16x2048xf32>
    %7 = tpu.matmul %3, %6, %cst_5 {dimension_numbers = #tpu.dot_dimension_numbers<[1], [0], [0], [1], [0, 0, 1, 1], [], []>} : vector<16x2xf32>, vector<2x2048xf32>, vector<16x2048xf32> -> vector<16x2048xf32>
    %c1 = arith.constant 1 : index
    %c0_6 = arith.constant 0 : index
    %c0_7 = arith.constant 0 : index
    %8 = vector.load %arg2[%c1, %c0_6, %c0_7] : memref<3x16x2xf32, #tpu.memory_space<vmem>>, vector<1x16x2xf32>
    %9 = vector.shape_cast %8 : vector<1x16x2xf32> to vector<16x2xf32>
    %cst_8 = arith.constant dense<0.000000e+00> : vector<16x2048xf32>
    %10 = tpu.matmul %9, %1, %cst_8 {dimension_numbers = #tpu.dot_dimension_numbers<[1], [0], [0], [1], [0, 0, 1, 1], [], []>} : vector<16x2xf32>, vector<2x2048xf32>, vector<16x2048xf32> -> vector<16x2048xf32>
    %11 = arith.addf %7, %10 : vector<16x2048xf32>
    %c2 = arith.constant 2 : index
    %c0_9 = arith.constant 0 : index
    %c0_10 = arith.constant 0 : index
    %12 = vector.load %arg2[%c2, %c0_9, %c0_10] : memref<3x16x2xf32, #tpu.memory_space<vmem>>, vector<1x16x2xf32>
    %13 = vector.shape_cast %12 : vector<1x16x2xf32> to vector<16x2xf32>
    %cst_11 = arith.constant 0.000000e+00 : f32
    %14 = vector.broadcast %cst_11 : f32 to vector<2x128xf32>
    %15 = vector.extract_strided_slice %1 {offsets = [0, 128], sizes = [2, 1920], strides = [1, 1]} : vector<2x2048xf32> to vector<2x1920xf32>
    %16 = tpu.concatenate %15, %14 in 1 : vector<2x1920xf32>, vector<2x128xf32> -> vector<2x2048xf32>
    %cst_12 = arith.constant dense<0.000000e+00> : vector<16x2048xf32>
    %17 = tpu.matmul %13, %16, %cst_12 {dimension_numbers = #tpu.dot_dimension_numbers<[1], [0], [0], [1], [0, 0, 1, 1], [], []>} : vector<16x2xf32>, vector<2x2048xf32>, vector<16x2048xf32> -> vector<16x2048xf32>
    %18 = arith.addf %11, %17 : vector<16x2048xf32>
    %c0_13 = arith.constant 0 : index
    %c0_14 = arith.constant 0 : index
    %19 = vector.load %arg3[%c0_13, %c0_14] : memref<16x1xf32, #tpu.memory_space<vmem>>, vector<16x1xf32>
    %20 = vector.broadcast %19 : vector<16x1xf32> to vector<16x2048xf32>
    %21 = arith.addf %18, %20 : vector<16x2048xf32>
    %cst_15 = arith.constant 0.000000e+00 : f32
    %22 = vector.broadcast %cst_15 : f32 to vector<16x2048xf32>
    %23 = arith.maximumf %21, %22 : vector<16x2048xf32>
    %24 = vector.extract_strided_slice %23 {offsets = [0, 0], sizes = [16, 128], strides = [1, 1]} : vector<16x2048xf32> to vector<16x128xf32>
    %25 = vector.extract_strided_slice %23 {offsets = [0, 128], sizes = [16, 128], strides = [1, 1]} : vector<16x2048xf32> to vector<16x128xf32>
    %26 = arith.maximumf %24, %25 : vector<16x128xf32>
    %27 = vector.extract_strided_slice %23 {offsets = [0, 256], sizes = [16, 128], strides = [1, 1]} : vector<16x2048xf32> to vector<16x128xf32>
    %28 = vector.extract_strided_slice %23 {offsets = [0, 384], sizes = [16, 128], strides = [1, 1]} : vector<16x2048xf32> to vector<16x128xf32>
    %29 = arith.maximumf %27, %28 : vector<16x128xf32>
    %30 = vector.extract_strided_slice %23 {offsets = [0, 512], sizes = [16, 128], strides = [1, 1]} : vector<16x2048xf32> to vector<16x128xf32>
    %31 = vector.extract_strided_slice %23 {offsets = [0, 640], sizes = [16, 128], strides = [1, 1]} : vector<16x2048xf32> to vector<16x128xf32>
    %32 = arith.maximumf %30, %31 : vector<16x128xf32>
    %33 = vector.extract_strided_slice %23 {offsets = [0, 768], sizes = [16, 128], strides = [1, 1]} : vector<16x2048xf32> to vector<16x128xf32>
    %34 = vector.extract_strided_slice %23 {offsets = [0, 896], sizes = [16, 128], strides = [1, 1]} : vector<16x2048xf32> to vector<16x128xf32>
    %35 = arith.maximumf %33, %34 : vector<16x128xf32>
    %36 = vector.extract_strided_slice %23 {offsets = [0, 1024], sizes = [16, 128], strides = [1, 1]} : vector<16x2048xf32> to vector<16x128xf32>
    %37 = vector.extract_strided_slice %23 {offsets = [0, 1152], sizes = [16, 128], strides = [1, 1]} : vector<16x2048xf32> to vector<16x128xf32>
    %38 = arith.maximumf %36, %37 : vector<16x128xf32>
    %39 = vector.extract_strided_slice %23 {offsets = [0, 1280], sizes = [16, 128], strides = [1, 1]} : vector<16x2048xf32> to vector<16x128xf32>
    %40 = vector.extract_strided_slice %23 {offsets = [0, 1408], sizes = [16, 128], strides = [1, 1]} : vector<16x2048xf32> to vector<16x128xf32>
    %41 = arith.maximumf %39, %40 : vector<16x128xf32>
    %42 = vector.extract_strided_slice %23 {offsets = [0, 1536], sizes = [16, 128], strides = [1, 1]} : vector<16x2048xf32> to vector<16x128xf32>
    %43 = vector.extract_strided_slice %23 {offsets = [0, 1664], sizes = [16, 128], strides = [1, 1]} : vector<16x2048xf32> to vector<16x128xf32>
    %44 = arith.maximumf %42, %43 : vector<16x128xf32>
    %45 = vector.extract_strided_slice %23 {offsets = [0, 1792], sizes = [16, 128], strides = [1, 1]} : vector<16x2048xf32> to vector<16x128xf32>
    %46 = vector.extract_strided_slice %23 {offsets = [0, 1920], sizes = [16, 128], strides = [1, 1]} : vector<16x2048xf32> to vector<16x128xf32>
    %47 = arith.maximumf %45, %46 : vector<16x128xf32>
    %48 = tpu.concatenate %26, %29, %32, %35, %38, %41, %44, %47 in 1 : vector<16x128xf32>, vector<16x128xf32>, vector<16x128xf32>, vector<16x128xf32>, vector<16x128xf32>, vector<16x128xf32>, vector<16x128xf32>, vector<16x128xf32> -> vector<16x1024xf32>
    %cst_16 = arith.constant 0.000000e+00 : f32
    %49 = vector.broadcast %cst_16 : f32 to vector<16x128xf32>
    %50 = vector.extract_strided_slice %48 {offsets = [0, 0], sizes = [16, 896], strides = [1, 1]} : vector<16x1024xf32> to vector<16x896xf32>
    %51 = tpu.concatenate %49, %50 in 1 : vector<16x128xf32>, vector<16x896xf32> -> vector<16x1024xf32>
    %cst_17 = arith.constant 0.000000e+00 : f32
    %52 = vector.broadcast %cst_17 : f32 to vector<16x128xf32>
    %53 = vector.extract_strided_slice %48 {offsets = [0, 128], sizes = [16, 896], strides = [1, 1]} : vector<16x1024xf32> to vector<16x896xf32>
    %54 = tpu.concatenate %53, %52 in 1 : vector<16x896xf32>, vector<16x128xf32> -> vector<16x1024xf32>
    %55 = tpu.concatenate %51, %48, %54 in 0 : vector<16x1024xf32>, vector<16x1024xf32>, vector<16x1024xf32> -> vector<48x1024xf32>
    %c0_18 = arith.constant 0 : index
    %c0_19 = arith.constant 0 : index
    %56 = vector.load %arg4[%c0_18, %c0_19] : memref<8x48xf32, #tpu.memory_space<vmem>>, vector<8x48xf32>
    %cst_20 = arith.constant dense<0.000000e+00> : vector<8x1024xf32>
    %57 = tpu.matmul %56, %55, %cst_20 {dimension_numbers = #tpu.dot_dimension_numbers<[1], [0], [0], [1], [0, 0, 1, 1], [], []>} : vector<8x48xf32>, vector<48x1024xf32>, vector<8x1024xf32> -> vector<8x1024xf32>
    %c0_21 = arith.constant 0 : index
    %c0_22 = arith.constant 0 : index
    %58 = vector.load %arg5[%c0_21, %c0_22] : memref<8x1xf32, #tpu.memory_space<vmem>>, vector<8x1xf32>
    %59 = vector.broadcast %58 : vector<8x1xf32> to vector<8x1024xf32>
    %60 = arith.addf %57, %59 : vector<8x1024xf32>
    %cst_23 = arith.constant 0.000000e+00 : f32
    %61 = vector.broadcast %cst_23 : f32 to vector<8x1024xf32>
    %62 = arith.maximumf %60, %61 : vector<8x1024xf32>
    %63 = vector.extract_strided_slice %62 {offsets = [0, 0], sizes = [8, 128], strides = [1, 1]} : vector<8x1024xf32> to vector<8x128xf32>
    %64 = vector.extract_strided_slice %62 {offsets = [0, 128], sizes = [8, 128], strides = [1, 1]} : vector<8x1024xf32> to vector<8x128xf32>
    %65 = arith.maximumf %63, %64 : vector<8x128xf32>
    %66 = vector.extract_strided_slice %62 {offsets = [0, 256], sizes = [8, 128], strides = [1, 1]} : vector<8x1024xf32> to vector<8x128xf32>
    %67 = vector.extract_strided_slice %62 {offsets = [0, 384], sizes = [8, 128], strides = [1, 1]} : vector<8x1024xf32> to vector<8x128xf32>
    %68 = arith.maximumf %66, %67 : vector<8x128xf32>
    %69 = vector.extract_strided_slice %62 {offsets = [0, 512], sizes = [8, 128], strides = [1, 1]} : vector<8x1024xf32> to vector<8x128xf32>
    %70 = vector.extract_strided_slice %62 {offsets = [0, 640], sizes = [8, 128], strides = [1, 1]} : vector<8x1024xf32> to vector<8x128xf32>
    %71 = arith.maximumf %69, %70 : vector<8x128xf32>
    %72 = vector.extract_strided_slice %62 {offsets = [0, 768], sizes = [8, 128], strides = [1, 1]} : vector<8x1024xf32> to vector<8x128xf32>
    %73 = vector.extract_strided_slice %62 {offsets = [0, 896], sizes = [8, 128], strides = [1, 1]} : vector<8x1024xf32> to vector<8x128xf32>
    %74 = arith.maximumf %72, %73 : vector<8x128xf32>
    %75 = tpu.concatenate %65, %68, %71, %74 in 1 : vector<8x128xf32>, vector<8x128xf32>, vector<8x128xf32>, vector<8x128xf32> -> vector<8x512xf32>
    %c0_24 = arith.constant 0 : index
    %c0_25 = arith.constant 0 : index
    %76 = vector.load %arg6[%c0_24, %c0_25] : memref<32x8xf32, #tpu.memory_space<vmem>>, vector<32x8xf32>
    %cst_26 = arith.constant dense<0.000000e+00> : vector<32x512xf32>
    %77 = tpu.matmul %76, %75, %cst_26 {dimension_numbers = #tpu.dot_dimension_numbers<[1], [0], [0], [1], [0, 0, 1, 1], [], []>} : vector<32x8xf32>, vector<8x512xf32>, vector<32x512xf32> -> vector<32x512xf32>
    %c0_27 = arith.constant 0 : index
    %c0_28 = arith.constant 0 : index
    %78 = vector.load %arg7[%c0_27, %c0_28] : memref<32x1xf32, #tpu.memory_space<vmem>>, vector<32x1xf32>
    %79 = vector.broadcast %78 : vector<32x1xf32> to vector<32x512xf32>
    %80 = arith.addf %77, %79 : vector<32x512xf32>
    %cst_29 = arith.constant 0.000000e+00 : f32
    %81 = vector.broadcast %cst_29 : f32 to vector<32x512xf32>
    %82 = arith.maximumf %80, %81 : vector<32x512xf32>
    %83 = vector.extract_strided_slice %82 {offsets = [0, 0], sizes = [16, 512], strides = [1, 1]} : vector<32x512xf32> to vector<16x512xf32>
    %84 = vector.extract_strided_slice %82 {offsets = [16, 0], sizes = [16, 512], strides = [1, 1]} : vector<32x512xf32> to vector<16x512xf32>
    %c0_30 = arith.constant 0 : index
    %c0_31 = arith.constant 0 : index
    %c0_32 = arith.constant 0 : index
    %85 = vector.load %arg8[%c0_30, %c0_31, %c0_32] : memref<2x2x16xf32, #tpu.memory_space<vmem>>, vector<1x2x16xf32>
    %86 = vector.shape_cast %85 : vector<1x2x16xf32> to vector<2x16xf32>
    %cst_33 = arith.constant dense<0.000000e+00> : vector<2x512xf32>
    %87 = tpu.matmul %86, %83, %cst_33 {dimension_numbers = #tpu.dot_dimension_numbers<[1], [0], [0], [1], [0, 0, 1, 1], [], []>} : vector<2x16xf32>, vector<16x512xf32>, vector<2x512xf32> -> vector<2x512xf32>
    %c0_34 = arith.constant 0 : index
    %c0_35 = arith.constant 0 : index
    %88 = vector.load %arg9[%c0_34, %c0_35] : memref<2x1xf32, #tpu.memory_space<vmem>>, vector<2x1xf32>
    %89 = vector.broadcast %88 : vector<2x1xf32> to vector<2x512xf32>
    %90 = arith.addf %87, %89 : vector<2x512xf32>
    %91 = arith.negf %90 : vector<2x512xf32>
    %92 = math.exp %91 : vector<2x512xf32>
    %cst_36 = arith.constant 1.000000e+00 : f32
    %93 = vector.broadcast %cst_36 : f32 to vector<2x512xf32>
    %94 = arith.addf %93, %92 : vector<2x512xf32>
    %95 = arith.divf %93, %94 : vector<2x512xf32>
    %c1_37 = arith.constant 1 : index
    %c0_38 = arith.constant 0 : index
    %c0_39 = arith.constant 0 : index
    %96 = vector.load %arg8[%c1_37, %c0_38, %c0_39] : memref<2x2x16xf32, #tpu.memory_space<vmem>>, vector<1x2x16xf32>
    %97 = vector.shape_cast %96 : vector<1x2x16xf32> to vector<2x16xf32>
    %cst_40 = arith.constant dense<0.000000e+00> : vector<2x512xf32>
    %98 = tpu.matmul %97, %83, %cst_40 {dimension_numbers = #tpu.dot_dimension_numbers<[1], [0], [0], [1], [0, 0, 1, 1], [], []>} : vector<2x16xf32>, vector<16x512xf32>, vector<2x512xf32> -> vector<2x512xf32>
    %c0_41 = arith.constant 0 : index
    %c0_42 = arith.constant 0 : index
    %99 = vector.load %arg9[%c0_41, %c0_42] : memref<2x1xf32, #tpu.memory_space<vmem>>, vector<2x1xf32>
    %100 = vector.broadcast %99 : vector<2x1xf32> to vector<2x512xf32>
    %101 = arith.addf %98, %100 : vector<2x512xf32>
    %102 = arith.negf %101 : vector<2x512xf32>
    %103 = math.exp %102 : vector<2x512xf32>
    %cst_43 = arith.constant 1.000000e+00 : f32
    %104 = vector.broadcast %cst_43 : f32 to vector<2x512xf32>
    %105 = arith.addf %104, %103 : vector<2x512xf32>
    %106 = arith.divf %104, %105 : vector<2x512xf32>
    %c0_44 = arith.constant 0 : index
    %c0_45 = arith.constant 0 : index
    %c0_46 = arith.constant 0 : index
    %107 = vector.load %arg8[%c0_44, %c0_45, %c0_46] : memref<2x2x16xf32, #tpu.memory_space<vmem>>, vector<1x2x16xf32>
    %108 = vector.shape_cast %107 : vector<1x2x16xf32> to vector<2x16xf32>
    %cst_47 = arith.constant dense<0.000000e+00> : vector<2x512xf32>
    %109 = tpu.matmul %108, %84, %cst_47 {dimension_numbers = #tpu.dot_dimension_numbers<[1], [0], [0], [1], [0, 0, 1, 1], [], []>} : vector<2x16xf32>, vector<16x512xf32>, vector<2x512xf32> -> vector<2x512xf32>
    %c0_48 = arith.constant 0 : index
    %c0_49 = arith.constant 0 : index
    %110 = vector.load %arg9[%c0_48, %c0_49] : memref<2x1xf32, #tpu.memory_space<vmem>>, vector<2x1xf32>
    %111 = vector.broadcast %110 : vector<2x1xf32> to vector<2x512xf32>
    %112 = arith.addf %109, %111 : vector<2x512xf32>
    %113 = arith.negf %112 : vector<2x512xf32>
    %114 = math.exp %113 : vector<2x512xf32>
    %cst_50 = arith.constant 1.000000e+00 : f32
    %115 = vector.broadcast %cst_50 : f32 to vector<2x512xf32>
    %116 = arith.addf %115, %114 : vector<2x512xf32>
    %117 = arith.divf %115, %116 : vector<2x512xf32>
    %c1_51 = arith.constant 1 : index
    %c0_52 = arith.constant 0 : index
    %c0_53 = arith.constant 0 : index
    %118 = vector.load %arg8[%c1_51, %c0_52, %c0_53] : memref<2x2x16xf32, #tpu.memory_space<vmem>>, vector<1x2x16xf32>
    %119 = vector.shape_cast %118 : vector<1x2x16xf32> to vector<2x16xf32>
    %cst_54 = arith.constant dense<0.000000e+00> : vector<2x512xf32>
    %120 = tpu.matmul %119, %84, %cst_54 {dimension_numbers = #tpu.dot_dimension_numbers<[1], [0], [0], [1], [0, 0, 1, 1], [], []>} : vector<2x16xf32>, vector<16x512xf32>, vector<2x512xf32> -> vector<2x512xf32>
    %c0_55 = arith.constant 0 : index
    %c0_56 = arith.constant 0 : index
    %121 = vector.load %arg9[%c0_55, %c0_56] : memref<2x1xf32, #tpu.memory_space<vmem>>, vector<2x1xf32>
    %122 = vector.broadcast %121 : vector<2x1xf32> to vector<2x512xf32>
    %123 = arith.addf %120, %122 : vector<2x512xf32>
    %124 = arith.negf %123 : vector<2x512xf32>
    %125 = math.exp %124 : vector<2x512xf32>
    %cst_57 = arith.constant 1.000000e+00 : f32
    %126 = vector.broadcast %cst_57 : f32 to vector<2x512xf32>
    %127 = arith.addf %126, %125 : vector<2x512xf32>
    %128 = arith.divf %126, %127 : vector<2x512xf32>
    %129 = vector.extract_strided_slice %95 {offsets = [0, 0], sizes = [2, 128], strides = [1, 1]} : vector<2x512xf32> to vector<2x128xf32>
    %c0_58 = arith.constant 0 : index
    %c0_59 = arith.constant 0 : index
    %c0_60 = arith.constant 0 : index
    %130 = vector.load %arg10[%c0_58, %c0_59, %c0_60] : memref<1x2x2048xf32, #tpu.memory_space<vmem>>, vector<1x2x128xf32>
    %131 = vector.shape_cast %130 : vector<1x2x128xf32> to vector<2x128xf32>
    %132 = vector.shape_cast %129 : vector<2x128xf32> to vector<1x2x128xf32>
    tpu.vector_store %arg10[%c0_58, %c0_59, %c0_60], %132 {strides = array<i32>} : memref<1x2x2048xf32, #tpu.memory_space<vmem>>, vector<1x2x128xf32>,
    %133 = vector.extract_strided_slice %106 {offsets = [0, 0], sizes = [2, 128], strides = [1, 1]} : vector<2x512xf32> to vector<2x128xf32>
    %c0_61 = arith.constant 0 : index
    %c0_62 = arith.constant 0 : index
    %c128 = arith.constant 128 : index
    %134 = vector.load %arg10[%c0_61, %c0_62, %c128] : memref<1x2x2048xf32, #tpu.memory_space<vmem>>, vector<1x2x128xf32>
    %135 = vector.shape_cast %134 : vector<1x2x128xf32> to vector<2x128xf32>
    %136 = vector.shape_cast %133 : vector<2x128xf32> to vector<1x2x128xf32>
    tpu.vector_store %arg10[%c0_61, %c0_62, %c128], %136 {strides = array<i32>} : memref<1x2x2048xf32, #tpu.memory_space<vmem>>, vector<1x2x128xf32>,
    %137 = vector.extract_strided_slice %117 {offsets = [0, 0], sizes = [2, 128], strides = [1, 1]} : vector<2x512xf32> to vector<2x128xf32>
    %c0_63 = arith.constant 0 : index
    %c0_64 = arith.constant 0 : index
    %c256 = arith.constant 256 : index
    %138 = vector.load %arg10[%c0_63, %c0_64, %c256] : memref<1x2x2048xf32, #tpu.memory_space<vmem>>, vector<1x2x128xf32>
    %139 = vector.shape_cast %138 : vector<1x2x128xf32> to vector<2x128xf32>
    %140 = vector.shape_cast %137 : vector<2x128xf32> to vector<1x2x128xf32>
    tpu.vector_store %arg10[%c0_63, %c0_64, %c256], %140 {strides = array<i32>} : memref<1x2x2048xf32, #tpu.memory_space<vmem>>, vector<1x2x128xf32>,
    %141 = vector.extract_strided_slice %128 {offsets = [0, 0], sizes = [2, 128], strides = [1, 1]} : vector<2x512xf32> to vector<2x128xf32>
    %c0_65 = arith.constant 0 : index
    %c0_66 = arith.constant 0 : index
    %c384 = arith.constant 384 : index
    %142 = vector.load %arg10[%c0_65, %c0_66, %c384] : memref<1x2x2048xf32, #tpu.memory_space<vmem>>, vector<1x2x128xf32>
    %143 = vector.shape_cast %142 : vector<1x2x128xf32> to vector<2x128xf32>
    %144 = vector.shape_cast %141 : vector<2x128xf32> to vector<1x2x128xf32>
    tpu.vector_store %arg10[%c0_65, %c0_66, %c384], %144 {strides = array<i32>} : memref<1x2x2048xf32, #tpu.memory_space<vmem>>, vector<1x2x128xf32>,
    %145 = vector.extract_strided_slice %95 {offsets = [0, 128], sizes = [2, 128], strides = [1, 1]} : vector<2x512xf32> to vector<2x128xf32>
    %c0_67 = arith.constant 0 : index
    %c0_68 = arith.constant 0 : index
    %c512 = arith.constant 512 : index
    %146 = vector.load %arg10[%c0_67, %c0_68, %c512] : memref<1x2x2048xf32, #tpu.memory_space<vmem>>, vector<1x2x128xf32>
    %147 = vector.shape_cast %146 : vector<1x2x128xf32> to vector<2x128xf32>
    %148 = vector.shape_cast %145 : vector<2x128xf32> to vector<1x2x128xf32>
    tpu.vector_store %arg10[%c0_67, %c0_68, %c512], %148 {strides = array<i32>} : memref<1x2x2048xf32, #tpu.memory_space<vmem>>, vector<1x2x128xf32>,
    %149 = vector.extract_strided_slice %106 {offsets = [0, 128], sizes = [2, 128], strides = [1, 1]} : vector<2x512xf32> to vector<2x128xf32>
    %c0_69 = arith.constant 0 : index
    %c0_70 = arith.constant 0 : index
    %c640 = arith.constant 640 : index
    %150 = vector.load %arg10[%c0_69, %c0_70, %c640] : memref<1x2x2048xf32, #tpu.memory_space<vmem>>, vector<1x2x128xf32>
    %151 = vector.shape_cast %150 : vector<1x2x128xf32> to vector<2x128xf32>
    %152 = vector.shape_cast %149 : vector<2x128xf32> to vector<1x2x128xf32>
    tpu.vector_store %arg10[%c0_69, %c0_70, %c640], %152 {strides = array<i32>} : memref<1x2x2048xf32, #tpu.memory_space<vmem>>, vector<1x2x128xf32>,
    %153 = vector.extract_strided_slice %117 {offsets = [0, 128], sizes = [2, 128], strides = [1, 1]} : vector<2x512xf32> to vector<2x128xf32>
    %c0_71 = arith.constant 0 : index
    %c0_72 = arith.constant 0 : index
    %c768 = arith.constant 768 : index
    %154 = vector.load %arg10[%c0_71, %c0_72, %c768] : memref<1x2x2048xf32, #tpu.memory_space<vmem>>, vector<1x2x128xf32>
    %155 = vector.shape_cast %154 : vector<1x2x128xf32> to vector<2x128xf32>
    %156 = vector.shape_cast %153 : vector<2x128xf32> to vector<1x2x128xf32>
    tpu.vector_store %arg10[%c0_71, %c0_72, %c768], %156 {strides = array<i32>} : memref<1x2x2048xf32, #tpu.memory_space<vmem>>, vector<1x2x128xf32>,
    %157 = vector.extract_strided_slice %128 {offsets = [0, 128], sizes = [2, 128], strides = [1, 1]} : vector<2x512xf32> to vector<2x128xf32>
    %c0_73 = arith.constant 0 : index
    %c0_74 = arith.constant 0 : index
    %c896 = arith.constant 896 : index
    %158 = vector.load %arg10[%c0_73, %c0_74, %c896] : memref<1x2x2048xf32, #tpu.memory_space<vmem>>, vector<1x2x128xf32>
    %159 = vector.shape_cast %158 : vector<1x2x128xf32> to vector<2x128xf32>
    %160 = vector.shape_cast %157 : vector<2x128xf32> to vector<1x2x128xf32>
    tpu.vector_store %arg10[%c0_73, %c0_74, %c896], %160 {strides = array<i32>} : memref<1x2x2048xf32, #tpu.memory_space<vmem>>, vector<1x2x128xf32>,
    %161 = vector.extract_strided_slice %95 {offsets = [0, 256], sizes = [2, 128], strides = [1, 1]} : vector<2x512xf32> to vector<2x128xf32>
    %c0_75 = arith.constant 0 : index
    %c0_76 = arith.constant 0 : index
    %c1024 = arith.constant 1024 : index
    %162 = vector.load %arg10[%c0_75, %c0_76, %c1024] : memref<1x2x2048xf32, #tpu.memory_space<vmem>>, vector<1x2x128xf32>
    %163 = vector.shape_cast %162 : vector<1x2x128xf32> to vector<2x128xf32>
    %164 = vector.shape_cast %161 : vector<2x128xf32> to vector<1x2x128xf32>
    tpu.vector_store %arg10[%c0_75, %c0_76, %c1024], %164 {strides = array<i32>} : memref<1x2x2048xf32, #tpu.memory_space<vmem>>, vector<1x2x128xf32>,
    %165 = vector.extract_strided_slice %106 {offsets = [0, 256], sizes = [2, 128], strides = [1, 1]} : vector<2x512xf32> to vector<2x128xf32>
    %c0_77 = arith.constant 0 : index
    %c0_78 = arith.constant 0 : index
    %c1152 = arith.constant 1152 : index
    %166 = vector.load %arg10[%c0_77, %c0_78, %c1152] : memref<1x2x2048xf32, #tpu.memory_space<vmem>>, vector<1x2x128xf32>
    %167 = vector.shape_cast %166 : vector<1x2x128xf32> to vector<2x128xf32>
    %168 = vector.shape_cast %165 : vector<2x128xf32> to vector<1x2x128xf32>
    tpu.vector_store %arg10[%c0_77, %c0_78, %c1152], %168 {strides = array<i32>} : memref<1x2x2048xf32, #tpu.memory_space<vmem>>, vector<1x2x128xf32>,
    %169 = vector.extract_strided_slice %117 {offsets = [0, 256], sizes = [2, 128], strides = [1, 1]} : vector<2x512xf32> to vector<2x128xf32>
    %c0_79 = arith.constant 0 : index
    %c0_80 = arith.constant 0 : index
    %c1280 = arith.constant 1280 : index
    %170 = vector.load %arg10[%c0_79, %c0_80, %c1280] : memref<1x2x2048xf32, #tpu.memory_space<vmem>>, vector<1x2x128xf32>
    %171 = vector.shape_cast %170 : vector<1x2x128xf32> to vector<2x128xf32>
    %172 = vector.shape_cast %169 : vector<2x128xf32> to vector<1x2x128xf32>
    tpu.vector_store %arg10[%c0_79, %c0_80, %c1280], %172 {strides = array<i32>} : memref<1x2x2048xf32, #tpu.memory_space<vmem>>, vector<1x2x128xf32>,
    %173 = vector.extract_strided_slice %128 {offsets = [0, 256], sizes = [2, 128], strides = [1, 1]} : vector<2x512xf32> to vector<2x128xf32>
    %c0_81 = arith.constant 0 : index
    %c0_82 = arith.constant 0 : index
    %c1408 = arith.constant 1408 : index
    %174 = vector.load %arg10[%c0_81, %c0_82, %c1408] : memref<1x2x2048xf32, #tpu.memory_space<vmem>>, vector<1x2x128xf32>
    %175 = vector.shape_cast %174 : vector<1x2x128xf32> to vector<2x128xf32>
    %176 = vector.shape_cast %173 : vector<2x128xf32> to vector<1x2x128xf32>
    tpu.vector_store %arg10[%c0_81, %c0_82, %c1408], %176 {strides = array<i32>} : memref<1x2x2048xf32, #tpu.memory_space<vmem>>, vector<1x2x128xf32>,
    %177 = vector.extract_strided_slice %95 {offsets = [0, 384], sizes = [2, 128], strides = [1, 1]} : vector<2x512xf32> to vector<2x128xf32>
    %c0_83 = arith.constant 0 : index
    %c0_84 = arith.constant 0 : index
    %c1536 = arith.constant 1536 : index
    %178 = vector.load %arg10[%c0_83, %c0_84, %c1536] : memref<1x2x2048xf32, #tpu.memory_space<vmem>>, vector<1x2x128xf32>
    %179 = vector.shape_cast %178 : vector<1x2x128xf32> to vector<2x128xf32>
    %180 = vector.shape_cast %177 : vector<2x128xf32> to vector<1x2x128xf32>
    tpu.vector_store %arg10[%c0_83, %c0_84, %c1536], %180 {strides = array<i32>} : memref<1x2x2048xf32, #tpu.memory_space<vmem>>, vector<1x2x128xf32>,
    %181 = vector.extract_strided_slice %106 {offsets = [0, 384], sizes = [2, 128], strides = [1, 1]} : vector<2x512xf32> to vector<2x128xf32>
    %c0_85 = arith.constant 0 : index
    %c0_86 = arith.constant 0 : index
    %c1664 = arith.constant 1664 : index
    %182 = vector.load %arg10[%c0_85, %c0_86, %c1664] : memref<1x2x2048xf32, #tpu.memory_space<vmem>>, vector<1x2x128xf32>
    %183 = vector.shape_cast %182 : vector<1x2x128xf32> to vector<2x128xf32>
    %184 = vector.shape_cast %181 : vector<2x128xf32> to vector<1x2x128xf32>
    tpu.vector_store %arg10[%c0_85, %c0_86, %c1664], %184 {strides = array<i32>} : memref<1x2x2048xf32, #tpu.memory_space<vmem>>, vector<1x2x128xf32>,
    %185 = vector.extract_strided_slice %117 {offsets = [0, 384], sizes = [2, 128], strides = [1, 1]} : vector<2x512xf32> to vector<2x128xf32>
    %c0_87 = arith.constant 0 : index
    %c0_88 = arith.constant 0 : index
    %c1792 = arith.constant 1792 : index
    %186 = vector.load %arg10[%c0_87, %c0_88, %c1792] : memref<1x2x2048xf32, #tpu.memory_space<vmem>>, vector<1x2x128xf32>
    %187 = vector.shape_cast %186 : vector<1x2x128xf32> to vector<2x128xf32>
    %188 = vector.shape_cast %185 : vector<2x128xf32> to vector<1x2x128xf32>
    tpu.vector_store %arg10[%c0_87, %c0_88, %c1792], %188 {strides = array<i32>} : memref<1x2x2048xf32, #tpu.memory_space<vmem>>, vector<1x2x128xf32>,
    %189 = vector.extract_strided_slice %128 {offsets = [0, 384], sizes = [2, 128], strides = [1, 1]} : vector<2x512xf32> to vector<2x128xf32>
    %c0_89 = arith.constant 0 : index
    %c0_90 = arith.constant 0 : index
    %c1920 = arith.constant 1920 : index
    %190 = vector.load %arg10[%c0_89, %c0_90, %c1920] : memref<1x2x2048xf32, #tpu.memory_space<vmem>>, vector<1x2x128xf32>
    %191 = vector.shape_cast %190 : vector<1x2x128xf32> to vector<2x128xf32>
    %192 = vector.shape_cast %189 : vector<2x128xf32> to vector<1x2x128xf32>
    tpu.vector_store %arg10[%c0_89, %c0_90, %c1920], %192 {strides = array<i32>} : memref<1x2x2048xf32, #tpu.memory_space<vmem>>, vector<1x2x128xf32>,
    return
  }
  func.func @transform_0(%arg0: i32) -> (i32, i32, i32) {
    %c0_i32 = arith.constant 0 : i32
    %c0_i32_0 = arith.constant 0 : i32
    %c0_i32_1 = arith.constant 0 : i32
    return %arg0, %c0_i32, %c0_i32_0 : i32, i32, i32
  }
  func.func @transform_1(%arg0: i32) -> (i32, i32, i32) {
    %c0_i32 = arith.constant 0 : i32
    %c0_i32_0 = arith.constant 0 : i32
    %c0_i32_1 = arith.constant 0 : i32
    %c0_i32_2 = arith.constant 0 : i32
    return %c0_i32, %c0_i32_0, %c0_i32_1 : i32, i32, i32
  }
  func.func @transform_2(%arg0: i32) -> (i32, i32) {
    %c0_i32 = arith.constant 0 : i32
    %c0_i32_0 = arith.constant 0 : i32
    %c0_i32_1 = arith.constant 0 : i32
    return %c0_i32, %c0_i32_0 : i32, i32
  }
  func.func @transform_3(%arg0: i32) -> (i32, i32) {
    %c0_i32 = arith.constant 0 : i32
    %c0_i32_0 = arith.constant 0 : i32
    %c0_i32_1 = arith.constant 0 : i32
    return %c0_i32, %c0_i32_0 : i32, i32
  }
  func.func @transform_4(%arg0: i32) -> (i32, i32) {
    %c0_i32 = arith.constant 0 : i32
    %c0_i32_0 = arith.constant 0 : i32
    %c0_i32_1 = arith.constant 0 : i32
    return %c0_i32, %c0_i32_0 : i32, i32
  }
  func.func @transform_5(%arg0: i32) -> (i32, i32) {
    %c0_i32 = arith.constant 0 : i32
    %c0_i32_0 = arith.constant 0 : i32
    %c0_i32_1 = arith.constant 0 : i32
    return %c0_i32, %c0_i32_0 : i32, i32
  }
  func.func @transform_6(%arg0: i32) -> (i32, i32) {
    %c0_i32 = arith.constant 0 : i32
    %c0_i32_0 = arith.constant 0 : i32
    %c0_i32_1 = arith.constant 0 : i32
    return %c0_i32, %c0_i32_0 : i32, i32
  }
  func.func @transform_7(%arg0: i32) -> (i32, i32, i32) {
    %c0_i32 = arith.constant 0 : i32
    %c0_i32_0 = arith.constant 0 : i32
    %c0_i32_1 = arith.constant 0 : i32
    %c0_i32_2 = arith.constant 0 : i32
    return %c0_i32, %c0_i32_0, %c0_i32_1 : i32, i32, i32
  }
  func.func @transform_8(%arg0: i32) -> (i32, i32) {
    %c0_i32 = arith.constant 0 : i32
    %c0_i32_0 = arith.constant 0 : i32
    %c0_i32_1 = arith.constant 0 : i32
    return %c0_i32, %c0_i32_0 : i32, i32
  }
  func.func @transform_9(%arg0: i32) -> (i32, i32, i32) {
    %c0_i32 = arith.constant 0 : i32
    %c0_i32_0 = arith.constant 0 : i32
    %c0_i32_1 = arith.constant 0 : i32
    return %arg0, %c0_i32, %c0_i32_0 : i32, i32, i32
  }
}

</mosaic_0001>

<bundles_post_ra>
// kernel: cnn_autoencoder_pallas.1
= control target key start
LH: loop header
LB: loop body
LE: loop exit
PB: predicated region body
PF: predicated region fallthrough
CT: control target
= control target key end

     0   :  { %v46_v0 = vlaneseq  ;;  %v3740_v2 = vmov 1983009808   ;;  %v3741_v4 = vmov 0.0   ;;  %v3742_v7 = vmov 0   ;;  %s4262_s0 = inlined_call_operand.vmem [shape: f32[1,2,2048], index: 0, kind: input, shape index: {}]   ;;  %s4263_s2 = inlined_call_operand.vmem [shape: f32[16,1], index: 2, kind: input, shape index: {}]   ;;  %s4264_s1 = inlined_call_operand.vmem [shape: f32[3,16,2], index: 1, kind: input, shape index: {}]   ;;  %s4265_s6 = inlined_call_operand.vmem [shape: f32[32,1], index: 6, kind: input, shape index: {}]   ;;  %s4266_s4 = inlined_call_operand.vmem [shape: f32[8,1], index: 4, kind: input, shape index: {}]   ;;  %s4267_s8 = inlined_call_operand.vmem [shape: f32[2,1], index: 8, kind: input, shape index: {}]   ;;  %s4268_s3 = inlined_call_operand.vmem [shape: f32[8,48], index: 3, kind: input, shape index: {}]   ;;  %s4269_s5 = inlined_call_operand.vmem [shape: f32[32,8], index: 5, kind: input, shape index: {}]   ;;  %s4270_s7 = inlined_call_operand.vmem [shape: f32[2,2,16], index: 7, kind: input, shape index: {}]   ;;  %s4271_s9 = inlined_call_operand.vmem [shape: f32[1,2,2048], index: 9, kind: output, shape index: {}]  }
   0x1   :  { %v32_v1 = vld [vmem:[%s4262_s0] sm:$0xff]  ;;  %v44_v3 = vunpack.c.l.s4 %v3740_v2  ;;  %217 = vmatprep.mubr.f32.mxu0 %v3741_v4  ;;  %294 = vmatprep.mubr.f32.mxu1 %v3741_v4  ;;  %v33_v6 = vld [vmem:[%s4262_s0 + $0x8] sm:$0xff]  ;;  %v34_v11 = vld [vmem:[%s4262_s0 + $0x10] sm:$0xff]  ;;  %vm120_vm0 = vcmask 1041408   ;;  %vm113_vm1 = vcmask 15360   ;;  %vm2150_vm2 = vcmask 392192  }
   0x2   :  { %v47_v5 = vshrl.u32 %v46_v0, 7  ;;  %3670 = vset.pattern.permute.xlu0 %v3742_v7  ;;  %3671 = vset.pattern.permute.xlu1 %v3742_v7  ;;  %v42_v8 = vcombine.high %v32_v1, %v32_v1  ;;  %v59_v10 = vcombine.high %v33_v6, %v33_v6  ;;  %v2051_v12 = vld [vmem:[%s4263_s2] sm:$0xff]  ;;  %v76_v14 = vcombine.high %v34_v11, %v34_v11  ;;  %v2052_v15 = vld [vmem:[%s4263_s2 + $0x8] sm:$0xff]  ;;  %v35_v22 = vld [vmem:[%s4262_s0 + $0x18] sm:$0xff] }
   0x3   :  { %v45_v9 = vunpack.c.0.s8 %v44_v3  ;;  %2055 = vperm.xlu0 %3670, %v2051_v12   ;;  %v3385_v23 = vld [vmem:[%s4264_s1 + $0x10] sm:$0xff]  ;;  %v93_v28 = vcombine.high %v35_v22, %v35_v22  ;;  %v3386_v29 = vld [vmem:[%s4264_s1 + $0x18] sm:$0xff]  ;;  %v2455_v34 = vld [vmem:[%s4265_s6 + $0x8] sm:$0xff]  ;;  %vm2478_vm3 = vcmask 64512   ;;  %vm2692_vm4 = vcmask 130048  }
   0x4   :  { %v2457_v37 = vld [vmem:[%s4265_s6 + $0x18] sm:$0xff]  ;;  %v36_v38 = vld [vmem:[%s4264_s1] sm:$0xff]  ;;  %v37_v39 = vld [vmem:[%s4264_s1 + $0x8] sm:$0xff] }
   0x5   :  { %v48_v13 = vsub.s32 %v45_v9, %v47_v5  ;;  %v3450_v40 = vld [vmem:[%s4264_s1 + $0x20] sm:$0xff]  ;;  %v3451_v41 = vld [vmem:[%s4264_s1 + $0x28] sm:$0xff]  ;;  %v2456_v44 = vld [vmem:[%s4265_s6 + $0x10] sm:$0xff] }
   0x6   :  { %v2144_v42 = vld [vmem:[%s4266_s4] sm:$0xff] }
   0x7   :  { %v3811_v16 = vrot.slane %v32_v1, %v48_v13  ;;  %v3813_v17 = vrot.slane %v42_v8, %v48_v13  ;;  %v3815_v18 = vrot.slane %v33_v6, %v48_v13  ;;  %v3817_v19 = vrot.slane %v59_v10, %v48_v13  ;;  %2060 = vperm.xlu0 %3670, %v2052_v15   ;;  %v2454_v43 = vld [vmem:[%s4265_s6] sm:$0xff] }
   0x8   :  { %v3833_v24 = vrot.slane %v34_v11, %v48_v13  ;;  %v3847_v27 = vrot.slane %v76_v14, %v48_v13  ;;  %v3876_v32 = vrot.slane %v35_v22, %v48_v13  ;;  %v3878_v33 = vrot.slane %v93_v28, %v48_v13  ;;  %2147 = vperm.xlu1 %3671, %v2144_v42   ;;  %v2686_v45 = vld [vmem:[%s4267_s8] sm:$0x3] }
   0x9   :  { %v3821_v20 = vcombine.high %v3811_v16, %v3811_v16  ;;  %v3825_v21 = vcombine.high %v3813_v17, %v3813_v17  ;;  %v3841_v25 = vcombine.high %v3815_v18, %v3815_v18  ;;  %v3845_v26 = vcombine.high %v3817_v19, %v3817_v19 }
   0xa   :  { %v3866_v30 = vcombine.high %v3833_v24, %v3833_v24  ;;  %v3870_v31 = vcombine.high %v3847_v27, %v3847_v27  ;;  %v3893_v35 = vcombine.high %v3876_v32, %v3876_v32  ;;  %v3897_v36 = vcombine.high %v3878_v33, %v3878_v33 }
   0xb   :  { %3387 = vmatprep.subr.msk.mxu0 %vm120_vm0, %v3821_v20  ;;  %3391 = vmatprep.subr.msk.mxu1 %vm120_vm0, %v3825_v21 }
   0xc   :  { %3388 = vmatpush1.msk.msra.mxu0 %vm120_vm0, %v3811_v16  ;;  %3392 = vmatpush1.msk.msra.mxu1 %vm120_vm0, %v3813_v17 }
   0xd   :  { %3389 = vmatmul.mubr.msk.f32.vlgmr.msra.gmra.mrb[0].mxu0 %vm113_vm1, %v3385_v23  ;;  %3393 = vmatmul.mubr.msk.f32.vlgmr.msra.gmra.mrb[0].mxu1 %vm113_vm1, %v3385_v23 }
   0xe   :  { %223 = vmatprep.mubr.f32.mxu0 %v3741_v4  ;;  %300 = vmatprep.mubr.f32.mxu1 %v3741_v4 }
   0xf   :  { %3395 = vmatprep.subr.msk.mxu0 %vm120_vm0, %v3841_v25  ;;  %3399 = vmatprep.subr.msk.mxu1 %vm120_vm0, %v3845_v26 }
  0x10   :  { %3396 = vmatpush1.msk.msra.mxu0 %vm120_vm0, %v3815_v18  ;;  %3400 = vmatpush1.msk.msra.mxu1 %vm120_vm0, %v3817_v19 }
  0x11   :  { %3390 = vmatmul.mubr.msk.f32.gmra.mrb[2].mxu0 %vm113_vm1, %v3386_v29  ;;  %3394 = vmatmul.mubr.msk.f32.gmra.mrb[2].mxu1 %vm113_vm1, %v3386_v29 }
  0x12   :  { %371 = vmatprep.mubr.f32.mxu0 %v3741_v4  ;;  %448 = vmatprep.mubr.f32.mxu1 %v3741_v4 }
  0x13   :  { %3403 = vmatprep.subr.msk.mxu0 %vm120_vm0, %v3866_v30  ;;  %3407 = vmatprep.subr.msk.mxu1 %vm120_vm0, %v3870_v31 }
  0x14   :  { %2465 = vperm.xlu0 %3670, %v2455_v34   ;;  %2460 = vperm.xlu1 %3671, %v2454_v43   ;;  %v3743_v43 = vmov 0.0|0.0  }
  0x15   :  { %3397 = vmatmul.mubr.msk.f32.vlgmr.msra.gmra.mrb[4].mxu0 %vm113_vm1, %v3385_v23  ;;  %3401 = vmatmul.mubr.msk.f32.vlgmr.msra.gmra.mrb[4].mxu1 %vm113_vm1, %v3385_v23 }
  0x16   :  { %377 = vmatprep.mubr.f32.mxu0 %v3741_v4  ;;  %454 = vmatprep.mubr.f32.mxu1 %v3741_v4 }
  0x17   :  { %3404 = vmatpush1.msk.msra.mxu0 %vm120_vm0, %v3833_v24  ;;  %3408 = vmatpush1.msk.msra.mxu1 %vm120_vm0, %v3847_v27 }
  0x18   :  { %3411 = vmatprep.subr.msk.mxu0 %vm120_vm0, %v3893_v35  ;;  %3415 = vmatprep.subr.msk.mxu1 %vm120_vm0, %v3897_v36 }
  0x19   :  { %3398 = vmatmul.mubr.msk.f32.gmra.mrb[6].mxu0 %vm113_vm1, %v3386_v29  ;;  %3402 = vmatmul.mubr.msk.f32.gmra.mrb[6].mxu1 %vm113_vm1, %v3386_v29 }
  0x1a   :  { %525 = vmatprep.mubr.f32.mxu0 %v3741_v4  ;;  %602 = vmatprep.mubr.f32.mxu1 %v3741_v4 }
  0x1b   :  { %2475 = vperm.xlu0 %3670, %v2457_v37   ;;  %2470 = vperm.xlu1 %3671, %v2456_v44  }
  0x1d   :  { %3405 = vmatmul.mubr.msk.f32.vlgmr.msra.gmra.mrb[8].mxu0 %vm113_vm1, %v3385_v23  ;;  %3409 = vmatmul.mubr.msk.f32.vlgmr.msra.gmra.mrb[8].mxu1 %vm113_vm1, %v3385_v23 }
  0x1e   :  { %531 = vmatprep.mubr.f32.mxu0 %v3741_v4  ;;  %608 = vmatprep.mubr.f32.mxu1 %v3741_v4 }
  0x1f   :  { %3412 = vmatpush1.msk.msra.mxu0 %vm120_vm0, %v3876_v32  ;;  %3416 = vmatpush1.msk.msra.mxu1 %vm120_vm0, %v3878_v33 }
  0x20   :  { %3419 = vmatprep.subr.msk.mxu0 %vm120_vm0, %v3811_v16  ;;  %3422 = vmatprep.subr.msk.mxu1 %vm120_vm0, %v3813_v17 }
  0x21   :  { %3406 = vmatmul.mubr.msk.f32.gmra.mrb[10].mxu0 %vm113_vm1, %v3386_v29  ;;  %3410 = vmatmul.mubr.msk.f32.gmra.mrb[10].mxu1 %vm113_vm1, %v3386_v29 }
  0x22   :  { %679 = vmatprep.mubr.f32.mxu0 %v3741_v4  ;;  %756 = vmatprep.mubr.f32.mxu1 %v3741_v4 }
  0x23   :  { %2689 = vperm.xlu1 %3671, %v2686_v45  }
  0x25   :  { %3413 = vmatmul.mubr.msk.f32.vlgmr.msra.gmra.mrb[12].mxu0 %vm113_vm1, %v3385_v23  ;;  %3417 = vmatmul.mubr.msk.f32.vlgmr.msra.gmra.mrb[12].mxu1 %vm113_vm1, %v3385_v23 }
  0x26   :  { %685 = vmatprep.mubr.f32.mxu0 %v3741_v4  ;;  %762 = vmatprep.mubr.f32.mxu1 %v3741_v4 }
  0x27   :  { %779 = vmatpush1.msra.mxu0 %v3741_v4  ;;  %3423 = vmatpush1.msk.msra.mxu1 %vm120_vm0, %v3821_v20 }
  0x28   :  { %3426 = vmatprep.subr.msk.mxu0 %vm120_vm0, %v3815_v18  ;;  %3430 = vmatprep.subr.msk.mxu1 %vm120_vm0, %v3817_v19 }
  0x29   :  { %3414 = vmatmul.mubr.msk.f32.gmra.mrb[14].mxu0 %vm113_vm1, %v3386_v29  ;;  %3418 = vmatmul.mubr.msk.f32.gmra.mrb[14].mxu1 %vm113_vm1, %v3386_v29 }
  0x2a   :  { %842 = vmatprep.mubr.f32.mxu0 %v3741_v4  ;;  %919 = vmatprep.mubr.f32.mxu1 %v3741_v4 }
  0x2d   :  { %3420 = vmatmul.mubr.msk.f32.vlgmr.msra.gmra.mrb[0].mxu0 %vm113_vm1, %v36_v38  ;;  %3424 = vmatmul.mubr.msk.f32.vlgmr.msra.gmra.mrb[0].mxu1 %vm113_vm1, %v36_v38 }
  0x2e   :  { %848 = vmatprep.mubr.f32.mxu0 %v3741_v4  ;;  %925 = vmatprep.mubr.f32.mxu1 %v3741_v4 }
  0x2f   :  { %3427 = vmatpush1.msk.msra.mxu0 %vm120_vm0, %v3825_v21  ;;  %3431 = vmatpush1.msk.msra.mxu1 %vm120_vm0, %v3841_v25 }
  0x30   :  { %3434 = vmatprep.subr.msk.mxu0 %vm120_vm0, %v3833_v24  ;;  %3438 = vmatprep.subr.msk.mxu1 %vm120_vm0, %v3847_v27 }
  0x31   :  { %3421 = vmatmul.mubr.msk.f32.gmra.mrb[2].mxu0 %vm113_vm1, %v37_v39  ;;  %3425 = vmatmul.mubr.msk.f32.gmra.mrb[2].mxu1 %vm113_vm1, %v37_v39 }
  0x32   :  { %996 = vmatprep.mubr.f32.mxu0 %v3741_v4  ;;  %1073 = vmatprep.mubr.f32.mxu1 %v3741_v4 }
  0x35   :  { %3428 = vmatmul.mubr.msk.f32.vlgmr.msra.gmra.mrb[4].mxu0 %vm113_vm1, %v36_v38  ;;  %3432 = vmatmul.mubr.msk.f32.vlgmr.msra.gmra.mrb[4].mxu1 %vm113_vm1, %v36_v38 }
  0x36   :  { %1002 = vmatprep.mubr.f32.mxu0 %v3741_v4  ;;  %1079 = vmatprep.mubr.f32.mxu1 %v3741_v4 }
  0x37   :  { %3435 = vmatpush1.msk.msra.mxu0 %vm120_vm0, %v3845_v26  ;;  %3439 = vmatpush1.msk.msra.mxu1 %vm120_vm0, %v3866_v30 }
  0x38   :  { %3442 = vmatprep.subr.msk.mxu0 %vm120_vm0, %v3876_v32  ;;  %3446 = vmatprep.subr.msk.mxu1 %vm120_vm0, %v3878_v33 }
  0x39   :  { %3429 = vmatmul.mubr.msk.f32.gmra.mrb[6].mxu0 %vm113_vm1, %v37_v39  ;;  %3433 = vmatmul.mubr.msk.f32.gmra.mrb[6].mxu1 %vm113_vm1, %v37_v39 }
  0x3a   :  { %1150 = vmatprep.mubr.f32.mxu0 %v3741_v4  ;;  %1227 = vmatprep.mubr.f32.mxu1 %v3741_v4 }
  0x3d   :  { %3436 = vmatmul.mubr.msk.f32.vlgmr.msra.gmra.mrb[8].mxu0 %vm113_vm1, %v36_v38  ;;  %3440 = vmatmul.mubr.msk.f32.vlgmr.msra.gmra.mrb[8].mxu1 %vm113_vm1, %v36_v38 }
  0x3e   :  { %1156 = vmatprep.mubr.f32.mxu0 %v3741_v4  ;;  %1233 = vmatprep.mubr.f32.mxu1 %v3741_v4 }
  0x3f   :  { %3443 = vmatpush1.msk.msra.mxu0 %vm120_vm0, %v3870_v31  ;;  %3447 = vmatpush1.msk.msra.mxu1 %vm120_vm0, %v3893_v35 }
  0x40   :  { %3452 = vmatprep.subr.msk.mxu0 %vm120_vm0, %v3813_v17  ;;  %3456 = vmatprep.subr.msk.mxu1 %vm120_vm0, %v3815_v18 }
  0x41   :  { %3437 = vmatmul.mubr.msk.f32.gmra.mrb[10].mxu0 %vm113_vm1, %v37_v39  ;;  %3441 = vmatmul.mubr.msk.f32.gmra.mrb[10].mxu1 %vm113_vm1, %v37_v39 }
  0x42   :  { %1304 = vmatprep.mubr.f32.mxu0 %v3741_v4  ;;  %1381 = vmatprep.mubr.f32.mxu1 %v3741_v4 }
  0x45   :  { %3444 = vmatmul.mubr.msk.f32.vlgmr.msra.gmra.mrb[12].mxu0 %vm113_vm1, %v36_v38  ;;  %3448 = vmatmul.mubr.msk.f32.vlgmr.msra.gmra.mrb[12].mxu1 %vm113_vm1, %v36_v38 }
  0x46   :  { %1310 = vmatprep.mubr.f32.mxu0 %v3741_v4  ;;  %1387 = vmatprep.mubr.f32.mxu1 %v3741_v4 }
  0x47   :  { %3453 = vmatpush1.msk.msra.mxu0 %vm120_vm0, %v3821_v20  ;;  %3457 = vmatpush1.msk.msra.mxu1 %vm120_vm0, %v3825_v21 }
  0x48   :  { %3460 = vmatprep.subr.msk.mxu0 %vm120_vm0, %v3817_v19  ;;  %3464 = vmatprep.subr.msk.mxu1 %vm120_vm0, %v3833_v24 }
  0x49   :  { %3445 = vmatmul.mubr.msk.f32.gmra.mrb[14].mxu0 %vm113_vm1, %v37_v39  ;;  %3449 = vmatmul.mubr.msk.f32.gmra.mrb[14].mxu1 %vm113_vm1, %v37_v39 }
  0x4a   :  { %1467 = vmatprep.mubr.f32.mxu0 %v3741_v4  ;;  %1544 = vmatprep.mubr.f32.mxu1 %v3741_v4 }
  0x4d   :  { %3454 = vmatmul.mubr.msk.f32.vlgmr.msra.gmra.mrb[0].mxu0 %vm113_vm1, %v3450_v40  ;;  %3458 = vmatmul.mubr.msk.f32.vlgmr.msra.gmra.mrb[0].mxu1 %vm113_vm1, %v3450_v40 }
  0x4e   :  { %1473 = vmatprep.mubr.f32.mxu0 %v3741_v4  ;;  %1550 = vmatprep.mubr.f32.mxu1 %v3741_v4 }
  0x4f   :  { %3461 = vmatpush1.msk.msra.mxu0 %vm120_vm0, %v3841_v25  ;;  %3465 = vmatpush1.msk.msra.mxu1 %vm120_vm0, %v3845_v26 }
  0x50   :  { %3468 = vmatprep.subr.msk.mxu0 %vm120_vm0, %v3847_v27  ;;  %3472 = vmatprep.subr.msk.mxu1 %vm120_vm0, %v3876_v32 }
  0x51   :  { %3455 = vmatmul.mubr.msk.f32.gmra.mrb[2].mxu0 %vm113_vm1, %v3451_v41  ;;  %3459 = vmatmul.mubr.msk.f32.gmra.mrb[2].mxu1 %vm113_vm1, %v3451_v41 }
  0x52   :  { %1621 = vmatprep.mubr.f32.mxu0 %v3741_v4  ;;  %1698 = vmatprep.mubr.f32.mxu1 %v3741_v4 }
  0x55   :  { %3462 = vmatmul.mubr.msk.f32.vlgmr.msra.gmra.mrb[4].mxu0 %vm113_vm1, %v3450_v40  ;;  %3466 = vmatmul.mubr.msk.f32.vlgmr.msra.gmra.mrb[4].mxu1 %vm113_vm1, %v3450_v40 }
  0x56   :  { %1627 = vmatprep.mubr.f32.mxu0 %v3741_v4  ;;  %1704 = vmatprep.mubr.f32.mxu1 %v3741_v4 }
  0x57   :  { %3469 = vmatpush1.msk.msra.mxu0 %vm120_vm0, %v3866_v30  ;;  %3473 = vmatpush1.msk.msra.mxu1 %vm120_vm0, %v3870_v31 }
  0x58   :  { %3476 = vmatprep.subr.msk.mxu0 %vm120_vm0, %v3878_v33  ;;  %3523 = vmatprep.subr.msk.mxu1 %vm120_vm0, %v3897_v36 }
  0x59   :  { %3463 = vmatmul.mubr.msk.f32.gmra.mrb[6].mxu0 %vm113_vm1, %v3451_v41  ;;  %3467 = vmatmul.mubr.msk.f32.gmra.mrb[6].mxu1 %vm113_vm1, %v3451_v41 }
  0x5a   :  { %1775 = vmatprep.mubr.f32.mxu0 %v3741_v4  ;;  %1852 = vmatprep.mubr.f32.mxu1 %v3741_v4 }
  0x5d   :  { %3470 = vmatmul.mubr.msk.f32.vlgmr.msra.gmra.mrb[8].mxu0 %vm113_vm1, %v3450_v40  ;;  %3474 = vmatmul.mubr.msk.f32.vlgmr.msra.gmra.mrb[8].mxu1 %vm113_vm1, %v3450_v40 }
  0x5e   :  { %1781 = vmatprep.mubr.f32.mxu0 %v3741_v4  ;;  %1858 = vmatprep.mubr.f32.mxu1 %v3741_v4 }
  0x5f   :  { %3477 = vmatpush1.msk.msra.mxu0 %vm120_vm0, %v3893_v35  ;;  %3524 = vmatpush3.msk.msra.mxu1 %vm120_vm0, %v3897_v36 }
  0x61   :  { %3471 = vmatmul.mubr.msk.f32.gmra.mrb[10].mxu0 %vm113_vm1, %v3451_v41  ;;  %3475 = vmatmul.mubr.msk.f32.gmra.mrb[10].mxu1 %vm113_vm1, %v3451_v41 }
  0x62   :  { %1929 = vmatprep.mubr.f32.mxu0 %v3741_v4  ;;  %3525 = vmatprep.mubr.msk.f32.mxu1 %vm113_vm1, %v3450_v40 }
  0x65   :  { %3478 = vmatmul.mubr.msk.f32.vlgmr.msra.gmra.mrb[12].mxu0 %vm113_vm1, %v3450_v40  ;;  %3526 = vmatmul.mubr.msk.f32.vlgmr.msra.gmra.mrb[16].mxu1 %vm113_vm1, %v3451_v41 }
  0x66   :  { %1935 = vmatprep.mubr.f32.mxu0 %v3741_v4  ;;  %2289 = vmatprep.mubr.f32.mxu1 %v3741_v4 }
  0x69   :  { %3479 = vmatmul.mubr.msk.f32.gmra.mrb[14].mxu0 %vm113_vm1, %v3451_v41 }
  0x6a   :  { %2218 = vmatprep.mubr.f32.mxu0 %v3741_v4 }
  0x82   :  { %v4093_v49 = vpop.permute.xlu0 %2055 }
  0x86   :  { %v4101_v59 = vpop.permute.xlu0 %2060 }
 0x118   :  { %v4087_v46 = vpop.f32.mrb[12].mxu1 }
 0x119   :  { %v4089_v47 = vpop.f32.mrb[13].mxu1 }
 0x11c   :  { %v4091_v48 = vpop.f32.mrb[14].mxu1 }
 0x11d   :  { %v4095_v50 = vpop.f32.mrb[15].mxu1 }
 0x120   :  { %v1469_v51 = vpop.f32.mrb[0].mxu0  ;;  %v1546_v52 = vpop.f32.mrb[0].mxu1 }
 0x121   :  { %v2063_v53 = vadd.f32 %v4093_v49, %v1469_v51  ;;  %v2065_v54 = vadd.f32 %v4093_v49, %v1546_v52  ;;  %v1471_v55 = vpop.f32.mrb[1].mxu0  ;;  %v1548_v56 = vpop.f32.mrb[1].mxu1 }
 0x122   :  { %v2064_v57 = vadd.f32 %v4093_v49, %v1471_v55  ;;  %v2066_v58 = vadd.f32 %v4093_v49, %v1548_v56 }
 0x123   :  { %v2095_v60 = vmax.f32 %v2063_v53, 0.0  ;;  %v2097_v61 = vmax.f32 %v2065_v54, 0.0 }
 0x124   :  { %v2096_v62 = vmax.f32 %v2064_v57, 0.0  ;;  %v2098_v63 = vmax.f32 %v2066_v58, 0.0  ;;  %v1475_v0 = vpop.f32.mrb[2].mxu0  ;;  %v1552_v1 = vpop.f32.mrb[2].mxu1 }
 0x125   :  { %v2079_v2 = vadd.f32 %v4101_v59, %v1475_v0  ;;  %v2081_v3 = vadd.f32 %v4101_v59, %v1552_v1  ;;  %v1477_v5 = vpop.f32.mrb[3].mxu0  ;;  %v1554_v6 = vpop.f32.mrb[3].mxu1 }
 0x126   :  { %v2127_v7 = vmax.f32 %v2095_v60, %v2096_v62  ;;  %v2129_v8 = vmax.f32 %v2097_v61, %v2098_v63  ;;  %v2080_v9 = vadd.f32 %v4101_v59, %v1477_v5  ;;  %v2082_v10 = vadd.f32 %v4101_v59, %v1554_v6 }
 0x127   :  { %v2111_v11 = vmax.f32 %v2079_v2, 0.0  ;;  %v2113_v12 = vmax.f32 %v2081_v3, 0.0 }
 0x128   :  { %v2112_v13 = vmax.f32 %v2080_v9, 0.0  ;;  %v2114_v14 = vmax.f32 %v2082_v10, 0.0  ;;  %v1623_v15 = vpop.f32.mrb[4].mxu0  ;;  %v1700_v16 = vpop.f32.mrb[4].mxu1 }
 0x129   :  { %v2067_v17 = vadd.f32 %v4093_v49, %v1623_v15  ;;  %v2069_v18 = vadd.f32 %v4093_v49, %v1700_v16  ;;  %v1625_v19 = vpop.f32.mrb[5].mxu0  ;;  %v1702_v20 = vpop.f32.mrb[5].mxu1 }
 0x12a   :  { %v2128_v21 = vmax.f32 %v2111_v11, %v2112_v13  ;;  %v2130_v22 = vmax.f32 %v2113_v12, %v2114_v14  ;;  %v2068_v23 = vadd.f32 %v4093_v49, %v1625_v19  ;;  %v2070_v24 = vadd.f32 %v4093_v49, %v1702_v20 }
 0x12b   :  { %v2099_v25 = vmax.f32 %v2067_v17, 0.0  ;;  %v2101_v26 = vmax.f32 %v2069_v18, 0.0  ;;  %v2143_v17 = vld [vmem:[%s4268_s3] sm:$0xff] }
 0x12c   :  { %v2100_v27 = vmax.f32 %v2068_v23, 0.0  ;;  %v2102_v28 = vmax.f32 %v2070_v24, 0.0  ;;  %v1629_v29 = vpop.f32.mrb[6].mxu0  ;;  %v1706_v30 = vpop.f32.mrb[6].mxu1  ;;  %v3528_v31 = vpack.c.bf16 %v2128_v21, %v2127_v7  ;;  %v3531_v32 = vpack.c.bf16 %v2130_v22, %v2129_v8 }
 0x12d   :  { %v2083_v33 = vadd.f32 %v4101_v59, %v1629_v29  ;;  %v2085_v34 = vadd.f32 %v4101_v59, %v1706_v30  ;;  %v1631_v35 = vpop.f32.mrb[7].mxu0  ;;  %v1708_v36 = vpop.f32.mrb[7].mxu1  ;;  %v2078_v22 = vadd.f32 %v4093_v49, %v4089_v47  ;;  %v2094_v23 = vadd.f32 %v4101_v59, %v4095_v50 }
 0x12e   :  { %v2131_v37 = vmax.f32 %v2099_v25, %v2100_v27  ;;  %v2133_v38 = vmax.f32 %v2101_v26, %v2102_v28  ;;  %v2084_v39 = vadd.f32 %v4101_v59, %v1631_v35  ;;  %v2086_v40 = vadd.f32 %v4101_v59, %v1708_v36  ;;  %3529 = vmatprep.subr.bf16.mxu0 %v3528_v31 }
 0x12f   :  { %v2115_v41 = vmax.f32 %v2083_v33, 0.0  ;;  %v2117_v42 = vmax.f32 %v2085_v34, 0.0  ;;  %3530 = vmatpush1.bf16.msra.mxu0 %v3743_v43  ;;  %v2126_v36 = vmax.f32 %v2094_v23, 0.0 }
 0x130   :  { %v2116_v44 = vmax.f32 %v2084_v39, 0.0  ;;  %v2118_v45 = vmax.f32 %v2086_v40, 0.0  ;;  %v1777_v51 = vpop.f32.mrb[8].mxu0  ;;  %v1854_v52 = vpop.f32.mrb[8].mxu1  ;;  %3532 = vmatprep.subr.bf16.mxu0 %v3531_v32 }
 0x131   :  { %v2071_v53 = vadd.f32 %v4093_v49, %v1777_v51  ;;  %v2073_v54 = vadd.f32 %v4093_v49, %v1854_v52  ;;  %v1779_v55 = vpop.f32.mrb[9].mxu0  ;;  %v1856_v56 = vpop.f32.mrb[9].mxu1 }
 0x132   :  { %v2132_v57 = vmax.f32 %v2115_v41, %v2116_v44  ;;  %v2134_v58 = vmax.f32 %v2117_v42, %v2118_v45  ;;  %v2072_v60 = vadd.f32 %v4093_v49, %v1779_v55  ;;  %v2074_v61 = vadd.f32 %v4093_v49, %v1856_v56 }
 0x133   :  { %v2103_v62 = vmax.f32 %v2071_v53, 0.0  ;;  %v2105_v63 = vmax.f32 %v2073_v54, 0.0  ;;  %3534 = vmatpush1.bf16.msra.mxu0 %v3528_v31 }
 0x134   :  { %v2104_v0 = vmax.f32 %v2072_v60, 0.0  ;;  %v2106_v1 = vmax.f32 %v2074_v61, 0.0  ;;  %v1783_v2 = vpop.f32.mrb[10].mxu0  ;;  %v1860_v3 = vpop.f32.mrb[10].mxu1  ;;  %v3535_v5 = vpack.c.bf16 %v2132_v57, %v2131_v37  ;;  %v3543_v6 = vpack.c.bf16 %v2134_v58, %v2133_v38 }
 0x135   :  { %v2087_v7 = vadd.f32 %v4101_v59, %v1783_v2  ;;  %v2089_v8 = vadd.f32 %v4101_v59, %v1860_v3  ;;  %v1785_v9 = vpop.f32.mrb[11].mxu0  ;;  %v1862_v10 = vpop.f32.mrb[11].mxu1 }
 0x136   :  { %v2135_v11 = vmax.f32 %v2103_v62, %v2104_v0  ;;  %v2137_v12 = vmax.f32 %v2105_v63, %v2106_v1  ;;  %v2088_v13 = vadd.f32 %v4101_v59, %v1785_v9  ;;  %v2090_v14 = vadd.f32 %v4101_v59, %v1862_v10  ;;  %3536 = vmatprep.subr.bf16.mxu0 %v3535_v5 }
 0x137   :  { %v2119_v15 = vmax.f32 %v2087_v7, 0.0  ;;  %v2121_v16 = vmax.f32 %v2089_v8, 0.0  ;;  %3540 = vmatprep.subr.bf16.mxu1 %v3535_v5  ;;  %3538 = vmatpush1.bf16.msra.mxu0 %v3531_v32 }
 0x138   :  { %v2120_v18 = vmax.f32 %v2088_v13, 0.0  ;;  %v2122_v19 = vmax.f32 %v2090_v14, 0.0  ;;  %3542 = vmatpush1.bf16.msra.mxu1 %v3531_v32  ;;  %v1931_v20 = vpop.f32.mrb[12].mxu0  ;;  %v3527_v21 = vpop.f32.mrb[16].mxu1 }
 0x139   :  { %v2075_v24 = vadd.f32 %v4093_v49, %v1931_v20  ;;  %v2049_v25 = vadd.f32 %v3527_v21, %v4091_v48  ;;  %3544 = vmatprep.subr.bf16.mxu1 %v3543_v6  ;;  %v1933_v26 = vpop.f32.mrb[13].mxu0  ;;  %v2008_v27 = vpop.f32.mrb[17].mxu1 }
 0x13a   :  { %v2136_v28 = vmax.f32 %v2119_v15, %v2120_v18  ;;  %v2138_v29 = vmax.f32 %v2121_v16, %v2122_v19  ;;  %v2076_v30 = vadd.f32 %v4093_v49, %v1933_v26  ;;  %v2033_v31 = vadd.f32 %v2008_v27, %v4087_v46  ;;  %3483 = vmatmul.mubr.msk.f32.vlgmr.msra.gmra.mrb[16].mxu0 %vm2150_vm2, %v2143_v17  ;;  %v2452_v16 = vld [vmem:[%s4269_s5 + $0x10] sm:$0xff] }
 0x13b   :  { %v2107_v32 = vmax.f32 %v2075_v24, 0.0  ;;  %v2093_v47 = vadd.f32 %v4101_v59, %v2049_v25  ;;  %2360 = vmatprep.mubr.f32.mxu0 %v3741_v4  ;;  %v2110_v46 = vmax.f32 %v2078_v22, 0.0  ;;  %v2453_v22 = vld [vmem:[%s4269_s5 + $0x18] sm:$0xff] }
 0x13c   :  { %v2108_v50 = vmax.f32 %v2076_v30, 0.0  ;;  %v2077_v33 = vadd.f32 %v4093_v49, %v2033_v31  ;;  %3546 = vmatpush1.bf16.msra.mxu1 %v3535_v5  ;;  %v1937_v48 = vpop.f32.mrb[14].mxu0  ;;  %v3547_v34 = vpack.c.bf16 %v2136_v28, %v2135_v11  ;;  %v3555_v35 = vpack.c.bf16 %v2138_v29, %v2137_v12  ;;  %v2451_v12 = vld [vmem:[%s4269_s5 + $0x8] sm:$0xff]  ;;  %v2466_v28 = vpop.permute.xlu0 %2465 }
 0x13d   :  { %v2125_v37 = vmax.f32 %v2093_v47, 0.0  ;;  %v2091_v38 = vadd.f32 %v4101_v59, %v1937_v48  ;;  %v1939_v39 = vpop.f32.mrb[15].mxu0 }
 0x13e   :  { %v2139_v40 = vmax.f32 %v2107_v32, %v2108_v50  ;;  %v2109_v41 = vmax.f32 %v2077_v33, 0.0  ;;  %v2092_v42 = vadd.f32 %v4101_v59, %v1939_v39  ;;  %3548 = vmatprep.subr.bf16.mxu1 %v3547_v34  ;;  %3552 = vmatprep.subr.bf16.mxu0 %v3547_v34  ;;  %v2148_v59 = vpop.permute.xlu1 %2147 }
 0x13f   :  { %v2142_v44 = vmax.f32 %v2125_v37, %v2126_v36  ;;  %v2123_v45 = vmax.f32 %v2091_v38, 0.0  ;;  %3554 = vmatpush1.bf16.msra.mxu0 %v3543_v6 }
 0x140   :  { %v2141_v49 = vmax.f32 %v2109_v41, %v2110_v46  ;;  %v2124_v51 = vmax.f32 %v2092_v42, 0.0  ;;  %3550 = vmatpush1.bf16.msra.mxu1 %v3543_v6  ;;  %3556 = vmatprep.subr.bf16.mxu0 %v3555_v35  ;;  %v2450_v6 = vld [vmem:[%s4269_s5] sm:$0xff] }
 0x142   :  { %v2140_v52 = vmax.f32 %v2123_v45, %v2124_v51  ;;  %v3567_v53 = vpack.c.bf16 %v2142_v44, %v2141_v49  ;;  %v2461_v26 = vpop.permute.xlu1 %2460  ;;  %v2685_v49 = vld [vmem:[%s4270_s7] sm:$0x3] }
 0x143   :  { %3484 = vmatmul.mubr.msk.f32.vlgmr.msra.gmra.mrb[18].mxu1 %vm2150_vm2, %v2143_v17  ;;  %3558 = vmatpush1.bf16.msra.mxu0 %v3547_v34 }
 0x144   :  { %v3559_v54 = vpack.c.bf16 %v2140_v52, %v2139_v40  ;;  %2431 = vmatprep.mubr.f32.mxu1 %v3741_v4  ;;  %v2476_v40 = vpop.permute.xlu0 %2475 }
 0x146   :  { %3560 = vmatprep.subr.bf16.mxu0 %v3559_v54  ;;  %3564 = vmatprep.subr.bf16.mxu1 %v3559_v54  ;;  %v2471_v38 = vpop.permute.xlu1 %2470 }
 0x147   :  { %3562 = vmatpush1.bf16.msra.mxu0 %v3555_v35  ;;  %3566 = vmatpush1.bf16.msra.mxu1 %v3555_v35 }
 0x148   :  { %3568 = vmatprep.subr.bf16.mxu1 %v3567_v53 }
 0x14a   :  { %3485 = vmatmul.mubr.msk.f32.vlgmr.msra.gmra.mrb[18].mxu0 %vm2150_vm2, %v2143_v17 }
 0x14b   :  { %3570 = vmatpush1.bf16.msra.mxu1 %v3559_v54  ;;  %2555 = vmatprep.mubr.f32.mxu0 %v3741_v4 }
 0x14c   :  { %3571 = vmatprep.subr.bf16.mxu1 %v3743_v43 }
 0x14f   :  { %3573 = vmatpush1.bf16.msra.mxu1 %v3567_v53 }
 0x152   :  { %3486 = vmatmul.mubr.msk.f32.vlgmr.msra.gmra.mrb[20].mxu1 %vm2150_vm2, %v2143_v17 }
 0x153   :  { %2644 = vmatprep.mubr.f32.mxu1 %v3741_v4 }
 0x20d   :  { %v2220_v55 = vpop.f32.mrb[16].mxu0 }
 0x20e   :  { %v2221_v56 = vadd.f32 %v2220_v55, %v2148_v59  ;;  %v2222_v57 = vpop.f32.mrb[17].mxu0 }
 0x20f   :  { %v2223_v58 = vadd.f32 %v2222_v57, %v2148_v59 }
 0x210   :  { %v2438_v60 = vmax.f32 %v2221_v56, 0.0 }
 0x211   :  { %v2439_v61 = vmax.f32 %v2223_v58, 0.0  ;;  %v3501_v58 = vld [vmem:[%s4270_s7 + $0x2] sm:$0x3] }
 0x213   :  { %v2446_v62 = vmax.f32 %v2438_v60, %v2439_v61 }
 0x216   :  { %v2291_v63 = vpop.f32.mrb[18].mxu1 }
 0x217   :  { %v2292_v0 = vadd.f32 %v2291_v63, %v2148_v59  ;;  %v2293_v1 = vpop.f32.mrb[19].mxu1 }
 0x218   :  { %v2294_v2 = vadd.f32 %v2293_v1, %v2148_v59 }
 0x219   :  { %v2440_v3 = vmax.f32 %v2292_v0, 0.0 }
 0x21a   :  { %v2441_v5 = vmax.f32 %v2294_v2, 0.0 }
 0x21c   :  { %v2447_v43 = vmax.f32 %v2440_v3, %v2441_v5 }
 0x21d   :  { %v2362_v7 = vpop.f32.mrb[18].mxu0 }
 0x21e   :  { %2491 = vmatprep.subr.mxu0 %v2447_v43  ;;  %v2363_v8 = vadd.f32 %v2362_v7, %v2148_v59  ;;  %v2364_v9 = vpop.f32.mrb[19].mxu0 }
 0x21f   :  { %2492 = vmatpush1.msra.mxu0 %v2446_v62  ;;  %v2365_v10 = vadd.f32 %v2364_v9, %v2148_v59 }
 0x220   :  { %3487 = vmatmul.mubr.msk.f32.vlgmr.msra.gmra.mrb[20].mxu0 %vm2478_vm3, %v2450_v6  ;;  %v2442_v11 = vmax.f32 %v2363_v8, 0.0 }
 0x221   :  { %2561 = vmatprep.mubr.f32.mxu0 %v3741_v4  ;;  %v2443_v13 = vmax.f32 %v2365_v10, 0.0 }
 0x223   :  { %v2448_v14 = vmax.f32 %v2442_v11, %v2443_v13 }
 0x224   :  { %3488 = vmatmul.mubr.msk.f32.gmra.mrb[22].mxu0 %vm2478_vm3, %v2451_v12 }
 0x225   :  { %v2433_v15 = vpop.f32.mrb[20].mxu1  ;;  %2567 = vmatprep.mubr.f32.mxu0 %v3741_v4 }
 0x226   :  { %v2434_v17 = vadd.f32 %v2433_v15, %v2148_v59  ;;  %v2435_v18 = vpop.f32.mrb[21].mxu1 }
 0x227   :  { %v2436_v19 = vadd.f32 %v2435_v18, %v2148_v59 }
 0x228   :  { %v2444_v20 = vmax.f32 %v2434_v17, 0.0  ;;  %3489 = vmatmul.mubr.msk.f32.gmra.mrb[24].mxu0 %vm2478_vm3, %v2452_v16 }
 0x229   :  { %v2445_v21 = vmax.f32 %v2436_v19, 0.0  ;;  %2573 = vmatprep.mubr.f32.mxu0 %v3741_v4 }
 0x22b   :  { %v2449_v23 = vmax.f32 %v2444_v20, %v2445_v21 }
 0x22c   :  { %3490 = vmatmul.mubr.msk.f32.gmra.mrb[26].mxu0 %vm2478_vm3, %v2453_v22 }
 0x22d   :  { %2580 = vmatprep.subr.mxu1 %v2449_v23  ;;  %2760 = vmatprep.mubr.f32.mxu0 %v3741_v4  ;;  %v4196_v23 = vpop.permute.xlu1 %2689 }
 0x22e   :  { %2581 = vmatpush1.msra.mxu1 %v2448_v14 }
 0x22f   :  { %3491 = vmatmul.mubr.msk.f32.vlgmr.msra.gmra.mrb[22].mxu1 %vm2478_vm3, %v2450_v6 }
 0x230   :  { %2650 = vmatprep.mubr.f32.mxu1 %v3741_v4 }
 0x233   :  { %3492 = vmatmul.mubr.msk.f32.gmra.mrb[24].mxu1 %vm2478_vm3, %v2451_v12 }
 0x234   :  { %2656 = vmatprep.mubr.f32.mxu1 %v3741_v4 }
 0x237   :  { %3493 = vmatmul.mubr.msk.f32.gmra.mrb[26].mxu1 %vm2478_vm3, %v2452_v16 }
 0x238   :  { %2662 = vmatprep.mubr.f32.mxu1 %v3741_v4 }
 0x23b   :  { %3494 = vmatmul.mubr.msk.f32.gmra.mrb[28].mxu1 %vm2478_vm3, %v2453_v22 }
 0x23c   :  { %2831 = vmatprep.mubr.f32.mxu1 %v3741_v4 }
 0x2f3   :  { %v2557_v24 = vpop.f32.mrb[20].mxu0 }
 0x2f4   :  { %v2559_v25 = vpop.f32.mrb[21].mxu0  ;;  %v2558_v27 = vadd.f32 %v2557_v24, %v2461_v26 }
 0x2f5   :  { %v2560_v29 = vadd.f32 %v2559_v25, %v2461_v26 }
 0x2f6   :  { %v2669_v50 = vmax.f32 %v2558_v27, 0.0 }
 0x2f7   :  { %v2563_v30 = vpop.f32.mrb[22].mxu0  ;;  %v2670_v48 = vmax.f32 %v2560_v29, 0.0 }
 0x2f8   :  { %v2564_v31 = vadd.f32 %v2563_v30, %v2466_v28  ;;  %v2565_v32 = vpop.f32.mrb[23].mxu0 }
 0x2f9   :  { %v2566_v47 = vadd.f32 %v2565_v32, %v2466_v28 }
 0x2fa   :  { %v2673_v33 = vmax.f32 %v2564_v31, 0.0 }
 0x2fb   :  { %v2674_v34 = vmax.f32 %v2566_v47, 0.0  ;;  %v2569_v35 = vpop.f32.mrb[24].mxu0 }
 0x2fc   :  { %v3576_v36 = vpack.c.bf16 %v2673_v33, %v2669_v50  ;;  %v2571_v37 = vpop.f32.mrb[25].mxu0  ;;  %v2570_v46 = vadd.f32 %v2569_v35, %v2471_v38 }
 0x2fd   :  { %v3574_v39 = vpack.c.bf16 %v2674_v34, %v2670_v48  ;;  %v2572_v41 = vadd.f32 %v2571_v37, %v2471_v38 }
 0x2fe   :  { %v2677_v52 = vmax.f32 %v2570_v46, 0.0 }
 0x2ff   :  { %v2575_v42 = vpop.f32.mrb[26].mxu0  ;;  %3575 = vmatprep.subr.bf16.mxu0 %v3574_v39  ;;  %v2678_v59 = vmax.f32 %v2572_v41, 0.0 }
 0x300   :  { %v2576_v44 = vadd.f32 %v2575_v42, %v2476_v40  ;;  %v2577_v45 = vpop.f32.mrb[27].mxu0  ;;  %3577 = vmatpush1.bf16.msra.mxu0 %v3576_v36 }
 0x301   :  { %v2578_v51 = vadd.f32 %v2577_v45, %v2476_v40  ;;  %3583 = vmatprep.subr.bf16.mxu0 %v3574_v39 }
 0x302   :  { %v2681_v53 = vmax.f32 %v2576_v44, 0.0  ;;  %v2646_v54 = vpop.f32.mrb[22].mxu1 }
 0x303   :  { %v2682_v55 = vmax.f32 %v2578_v51, 0.0  ;;  %3495 = vmatmul.mubr.msk.f32.vlgmr.msra.gmra.mrb[28].mxu0 %vm2692_vm4, %v2685_v49  ;;  %v2648_v56 = vpop.f32.mrb[23].mxu1  ;;  %v2647_v61 = vadd.f32 %v2646_v54, %v2461_v26 }
 0x304   :  { %v3592_v57 = vpack.c.bf16 %v2681_v53, %v2677_v52  ;;  %3585 = vmatpush1.bf16.msra.mxu0 %v3576_v36  ;;  %2931 = vmatprep.mubr.f32.mxu0 %v3741_v4  ;;  %v2649_v62 = vadd.f32 %v2648_v56, %v2461_v26 }
 0x305   :  { %v3590_v60 = vpack.c.bf16 %v2682_v55, %v2678_v59  ;;  %v2671_v3 = vmax.f32 %v2647_v61, 0.0 }
 0x306   :  { %v2652_v63 = vpop.f32.mrb[24].mxu1  ;;  %v2672_v43 = vmax.f32 %v2649_v62, 0.0 }
 0x307   :  { %v2653_v0 = vadd.f32 %v2652_v63, %v2466_v28  ;;  %3502 = vmatmul.mubr.msk.f32.vlgmr.msra.gmra.mrb[30].mxu0 %vm2692_vm4, %v3501_v58  ;;  %3591 = vmatprep.subr.bf16.mxu0 %v3590_v60  ;;  %v2654_v1 = vpop.f32.mrb[25].mxu1 }
 0x308   :  { %v2655_v2 = vadd.f32 %v2654_v1, %v2466_v28  ;;  %3593 = vmatpush1.bf16.msra.mxu0 %v3592_v57  ;;  %3097 = vmatprep.mubr.f32.mxu0 %v3741_v4 }
 0x309   :  { %v2675_v5 = vmax.f32 %v2653_v0, 0.0  ;;  %3599 = vmatprep.subr.bf16.mxu0 %v3590_v60 }
 0x30a   :  { %v2676_v6 = vmax.f32 %v2655_v2, 0.0  ;;  %v2658_v7 = vpop.f32.mrb[26].mxu1 }
 0x30b   :  { %v3580_v8 = vpack.c.bf16 %v2675_v5, %v2671_v3  ;;  %3508 = vmatmul.mubr.msk.f32.vlgmr.msra.gmra.mrb[32].mxu0 %vm2692_vm4, %v2685_v49  ;;  %v2660_v9 = vpop.f32.mrb[27].mxu1  ;;  %v2659_v11 = vadd.f32 %v2658_v7, %v2471_v38 }
 0x30c   :  { %v3578_v10 = vpack.c.bf16 %v2676_v6, %v2672_v43  ;;  %3601 = vmatpush1.bf16.msra.mxu0 %v3592_v57  ;;  %3263 = vmatprep.mubr.f32.mxu0 %v3741_v4  ;;  %v2661_v12 = vadd.f32 %v2660_v9, %v2471_v38 }
 0x30d   :  { %v2679_v17 = vmax.f32 %v2659_v11, 0.0 }
 0x30e   :  { %v2664_v13 = vpop.f32.mrb[28].mxu1  ;;  %3579 = vmatprep.subr.bf16.mxu1 %v3578_v10  ;;  %v2680_v19 = vmax.f32 %v2661_v12, 0.0 }
 0x30f   :  { %v2665_v14 = vadd.f32 %v2664_v13, %v2476_v40  ;;  %3514 = vmatmul.mubr.msk.f32.vlgmr.msra.gmra.mrb[34].mxu0 %vm2692_vm4, %v3501_v58  ;;  %v2666_v15 = vpop.f32.mrb[29].mxu1  ;;  %3581 = vmatpush1.bf16.msra.mxu1 %v3580_v8 }
 0x310   :  { %v2667_v16 = vadd.f32 %v2666_v15, %v2476_v40  ;;  %3587 = vmatprep.subr.bf16.mxu1 %v3578_v10 }
 0x311   :  { %v2683_v18 = vmax.f32 %v2665_v14, 0.0 }
 0x312   :  { %v2684_v20 = vmax.f32 %v2667_v16, 0.0  ;;  %3496 = vmatmul.mubr.msk.f32.vlgmr.msra.gmra.mrb[30].mxu1 %vm2692_vm4, %v2685_v49 }
 0x313   :  { %v3596_v21 = vpack.c.bf16 %v2683_v18, %v2679_v17  ;;  %3589 = vmatpush1.bf16.msra.mxu1 %v3580_v8  ;;  %3002 = vmatprep.mubr.f32.mxu1 %v3741_v4 }
 0x314   :  { %v3594_v22 = vpack.c.bf16 %v2684_v20, %v2680_v19 }
 0x316   :  { %3503 = vmatmul.mubr.msk.f32.vlgmr.msra.gmra.mrb[32].mxu1 %vm2692_vm4, %v3501_v58  ;;  %3595 = vmatprep.subr.bf16.mxu1 %v3594_v22 }
 0x317   :  { %3597 = vmatpush1.bf16.msra.mxu1 %v3596_v21  ;;  %3168 = vmatprep.mubr.f32.mxu1 %v3741_v4 }
 0x318   :  { %3603 = vmatprep.subr.bf16.mxu1 %v3594_v22 }
 0x31a   :  { %3509 = vmatmul.mubr.msk.f32.vlgmr.msra.gmra.mrb[34].mxu1 %vm2692_vm4, %v2685_v49 }
 0x31b   :  { %3605 = vmatpush1.bf16.msra.mxu1 %v3596_v21  ;;  %3334 = vmatprep.mubr.f32.mxu1 %v3741_v4 }
 0x31e   :  { %3515 = vmatmul.mubr.msk.f32.vlgmr.msra.gmra.mrb[36].mxu1 %vm2692_vm4, %v3501_v58 }
 0x3d6   :  { %v2762_v24 = vpop.f32.mrb[28].mxu0 }
 0x3d7   :  { %v2763_v25 = vadd.f32 %v2762_v24, %v4196_v23  ;;  %v2764_v26 = vpop.f32.mrb[29].mxu0 }
 0x3d8   :  { %v2765_v27 = vadd.f32 %v2764_v26, %v4196_v23 }
 0x3d9   :  { %v3497_v28 = vmul.f32 -1.442695, %v2763_v25 }
 0x3da   :  { %v3498_v29 = vmul.f32 -1.442695, %v2765_v27  ;;  %v2933_v30 = vpop.f32.mrb[30].mxu0 }
 0x3db   :  { %3676 = vpow2.f32 %v3497_v28  ;;  %v2934_v31 = vadd.f32 %v2933_v30, %v4196_v23  ;;  %v2935_v32 = vpop.f32.mrb[31].mxu0 }
 0x3dc   :  { %3678 = vpow2.f32 %v3498_v29  ;;  %v2936_v4 = vadd.f32 %v2935_v32, %v4196_v23 }
 0x3dd   :  { %v3504_v47 = vmul.f32 -1.442695, %v2934_v31 }
 0x3de   :  { %v3505_v50 = vmul.f32 -1.442695, %v2936_v4  ;;  %v3099_v33 = vpop.f32.mrb[32].mxu0 }
 0x3df   :  { %3680 = vpow2.f32 %v3504_v47  ;;  %v3100_v48 = vadd.f32 %v3099_v33, %v4196_v23  ;;  %v3101_v34 = vpop.f32.mrb[33].mxu0 }
 0x3e0   :  { %3682 = vpow2.f32 %v3505_v50  ;;  %v3102_v35 = vadd.f32 %v3101_v34, %v4196_v23 }
 0x3e1   :  { %v3510_v36 = vmul.f32 -1.442695, %v3100_v48 }
 0x3e2   :  { %v3511_v37 = vmul.f32 -1.442695, %v3102_v35  ;;  %v3265_v38 = vpop.f32.mrb[34].mxu0 }
 0x3e3   :  { %3684 = vpow2.f32 %v3510_v36  ;;  %v3266_v39 = vadd.f32 %v3265_v38, %v4196_v23  ;;  %v3267_v46 = vpop.f32.mrb[35].mxu0 }
 0x3e4   :  { %3686 = vpow2.f32 %v3511_v37  ;;  %v3268_v40 = vadd.f32 %v3267_v46, %v4196_v23 }
 0x3e5   :  { %v3677_v41 = vpop.eup %3676  ;;  %v3516_v42 = vmul.f32 -1.442695, %v3266_v39  ;;  %v2833_v44 = vpop.f32.mrb[30].mxu1 }
 0x3e6   :  { %v3679_v45 = vpop.eup %3678  ;;  %v2850_v49 = vadd.f32 1.0, %v3677_v41  ;;  %v3517_v51 = vmul.f32 -1.442695, %v3268_v40  ;;  %v2834_v52 = vadd.f32 %v2833_v44, %v4196_v23  ;;  %v2835_v53 = vpop.f32.mrb[31].mxu1 }
 0x3e7   :  { %v2851_v54 = vadd.f32 1.0, %v3679_v45  ;;  %3688 = vpow2.f32 %v3516_v42  ;;  %v2836_v59 = vadd.f32 %v2835_v53, %v4196_v23 }
 0x3e8   :  { %3690 = vrcp.f32 %v2850_v49  ;;  %v3499_v55 = vmul.f32 -1.442695, %v2834_v52 }
 0x3e9   :  { %v3681_v56 = vpop.eup %3680  ;;  %3692 = vrcp.f32 %v2851_v54  ;;  %v3004_v57 = vpop.f32.mrb[32].mxu1  ;;  %v3500_v61 = vmul.f32 -1.442695, %v2836_v59 }
 0x3ea   :  { %v3683_v58 = vpop.eup %3682  ;;  %v3021_v60 = vadd.f32 1.0, %v3681_v56  ;;  %3694 = vpow2.f32 %v3517_v51  ;;  %v3005_v62 = vadd.f32 %v3004_v57, %v4196_v23  ;;  %v3006_v63 = vpop.f32.mrb[33].mxu1 }
 0x3eb   :  { %v3022_v0 = vadd.f32 1.0, %v3683_v58  ;;  %3696 = vpow2.f32 %v3499_v55  ;;  %v3007_v1 = vadd.f32 %v3006_v63, %v4196_v23 }
 0x3ec   :  { %3698 = vrcp.f32 %v3021_v60  ;;  %v3506_v2 = vmul.f32 -1.442695, %v3005_v62 }
 0x3ed   :  { %v3685_v3 = vpop.eup %3684  ;;  %3700 = vrcp.f32 %v3022_v0  ;;  %v3170_v5 = vpop.f32.mrb[34].mxu1  ;;  %v3507_v7 = vmul.f32 -1.442695, %v3007_v1 }
 0x3ee   :  { %v3687_v43 = vpop.eup %3686  ;;  %v3187_v6 = vadd.f32 1.0, %v3685_v3  ;;  %3702 = vpow2.f32 %v3500_v61  ;;  %v3171_v8 = vadd.f32 %v3170_v5, %v4196_v23  ;;  %v3172_v9 = vpop.f32.mrb[35].mxu1 }
 0x3ef   :  { %v3188_v10 = vadd.f32 1.0, %v3687_v43  ;;  %3704 = vpow2.f32 %v3506_v2  ;;  %v3173_v11 = vadd.f32 %v3172_v9, %v4196_v23 }
 0x3f0   :  { %3706 = vrcp.f32 %v3187_v6  ;;  %v3512_v12 = vmul.f32 -1.442695, %v3171_v8 }
 0x3f1   :  { %v3689_v13 = vpop.eup %3688  ;;  %3708 = vrcp.f32 %v3188_v10  ;;  %v3513_v14 = vmul.f32 -1.442695, %v3173_v11  ;;  %v3336_v15 = vpop.f32.mrb[36].mxu1 }
 0x3f2   :  { %v3691_v16 = vpop.eup %3690  ;;  %v3353_v17 = vadd.f32 1.0, %v3689_v13  ;;  %3710 = vpow2.f32 %v3507_v7  ;;  %v3337_v18 = vadd.f32 %v3336_v15, %v4196_v23  ;;  %v3338_v19 = vpop.f32.mrb[37].mxu1 }
 0x3f3   :  { %v3693_v20 = vpop.eup %3692  ;;  %3365 = vst [vmem:[%s4271_s9] sm:$0x3] %v3691_v16  ;;  %3712 = vpow2.f32 %v3512_v12  ;;  %v3339_v21 = vadd.f32 %v3338_v19, %v4196_v23 }
 0x3f4   :  { %v3695_v22 = vpop.eup %3694  ;;  %3369 = vst [vmem:[%s4271_s9 + $0x8] sm:$0x3] %v3693_v20  ;;  %3714 = vrcp.f32 %v3353_v17  ;;  %v3518_v24 = vmul.f32 -1.442695, %v3337_v18 }
 0x3f5   :  { %v3697_v25 = vpop.eup %3696  ;;  %v3354_v26 = vadd.f32 1.0, %v3695_v22  ;;  %3716 = vpow2.f32 %v3513_v14  ;;  %v3519_v27 = vmul.f32 -1.442695, %v3339_v21 }
 0x3f6   :  { %v3699_v28 = vpop.eup %3698  ;;  %v2852_v29 = vadd.f32 1.0, %v3697_v25  ;;  %3718 = vpow2.f32 %v3518_v24 }
 0x3f7   :  { %v3701_v30 = vpop.eup %3700  ;;  %3366 = vst [vmem:[%s4271_s9 + $0x2] sm:$0x3] %v3699_v28  ;;  %3720 = vrcp.f32 %v3354_v26 }
 0x3f8   :  { %v3703_v23 = vpop.eup %3702  ;;  %3370 = vst [vmem:[%s4271_s9 + $0xa] sm:$0x3] %v3701_v30  ;;  %3722 = vrcp.f32 %v2852_v29 }
 0x3f9   :  { %v3705_v31 = vpop.eup %3704  ;;  %v2853_v32 = vadd.f32 1.0, %v3703_v23  ;;  %3724 = vpow2.f32 %v3519_v27 }
 0x3fa   :  { %v3707_v4 = vpop.eup %3706  ;;  %v3023_v47 = vadd.f32 1.0, %v3705_v31 }
 0x3fb   :  { %v3709_v50 = vpop.eup %3708  ;;  %3367 = vst [vmem:[%s4271_s9 + $0x4] sm:$0x3] %v3707_v4  ;;  %3726 = vrcp.f32 %v2853_v32 }
 0x3fc   :  { %v3711_v33 = vpop.eup %3710  ;;  %3371 = vst [vmem:[%s4271_s9 + $0xc] sm:$0x3] %v3709_v50  ;;  %3728 = vrcp.f32 %v3023_v47 }
 0x3fd   :  { %v3713_v48 = vpop.eup %3712  ;;  %v3024_v34 = vadd.f32 1.0, %v3711_v33 }
 0x3fe   :  { %v3715_v35 = vpop.eup %3714  ;;  %v3189_v36 = vadd.f32 1.0, %v3713_v48 }
 0x3ff   :  { %v3717_v37 = vpop.eup %3716  ;;  %3368 = vst [vmem:[%s4271_s9 + $0x6] sm:$0x3] %v3715_v35  ;;  %3730 = vrcp.f32 %v3024_v34 }
 0x400   :  { %v3719_v38 = vpop.eup %3718  ;;  %3732 = vrcp.f32 %v3189_v36  ;;  %v3190_v39 = vadd.f32 1.0, %v3717_v37 }
 0x401   :  { %v3721_v46 = vpop.eup %3720  ;;  %v3355_v40 = vadd.f32 1.0, %v3719_v38 }
 0x402   :  { %v3723_v41 = vpop.eup %3722  ;;  %3372 = vst [vmem:[%s4271_s9 + $0xe] sm:$0x3] %v3721_v46  ;;  %3734 = vrcp.f32 %v3190_v39 }
 0x403   :  { %v3725_v42 = vpop.eup %3724  ;;  %3373 = vst [vmem:[%s4271_s9 + $0x10] sm:$0x3] %v3723_v41  ;;  %3736 = vrcp.f32 %v3355_v40 }
 0x404   :  { %v3356_v44 = vadd.f32 1.0, %v3725_v42 }
 0x405   :  { %v3727_v45 = vpop.eup %3726 }
 0x406   :  { %v3729_v49 = vpop.eup %3728  ;;  %3377 = vst [vmem:[%s4271_s9 + $0x18] sm:$0x3] %v3727_v45  ;;  %3738 = vrcp.f32 %v3356_v44 }
 0x407   :  { %3374 = vst [vmem:[%s4271_s9 + $0x12] sm:$0x3] %v3729_v49 }
 0x409   :  { %v3731_v51 = vpop.eup %3730 }
 0x40a   :  { %v3733_v52 = vpop.eup %3732  ;;  %3378 = vst [vmem:[%s4271_s9 + $0x1a] sm:$0x3] %v3731_v51 }
 0x40b   :  { %3375 = vst [vmem:[%s4271_s9 + $0x14] sm:$0x3] %v3733_v52 }
 0x40c   :  { %v3735_v53 = vpop.eup %3734 }
 0x40d   :  { %v3737_v54 = vpop.eup %3736  ;;  %3379 = vst [vmem:[%s4271_s9 + $0x1c] sm:$0x3] %v3735_v53 }
 0x40e   :  { %3376 = vst [vmem:[%s4271_s9 + $0x16] sm:$0x3] %v3737_v54 }
 0x410   :  { %v3739_v59 = vpop.eup %3738 }
 0x411   :  { %3380 = vst [vmem:[%s4271_s9 + $0x1e] sm:$0x3] %v3739_v59 }

</bundles_post_ra>
